<compile_context>
chip_gen: v5e
topology: v5e:2x2
jax: 0.10.0
libtpu: 0.0.40
codegen_flags: <defaults>
</compile_context>

<pallas_src>
import jax
import jax.numpy as jnp
from jax import lax
from jax.experimental import pallas as pl
from jax.experimental.pallas import tpu as pltpu


_VMEM_LIMIT = 48 * 1024 * 1024   # safe on v5e/v6e (128 MiB) and v7x (64 MiB)


def _round_up(x, m):
    return ((x + m - 1) // m) * m


# --------------------- kernel A: LSTM + fused language code ---------------- #

def _query_lstm_kernel(xq_ref, len_ref, wih_ref, whh_ref, bg_ref,
                       wl_ref, bl_ref, out_ref, xp_ref):
    # xq_ref  [T, TB, Dl]     time-major query block (TB multiple of 8)
    # len_ref [TB, 1]         int32 valid lengths
    # wih_ref [Dl, 4*Hp]      bf16 gate-padded input weights (i,f,g,o blocks)
    # whh_ref [Hp, 4*Hp]      bf16 recurrent weights
    # bg_ref  [1, 4*Hp]       f32 bias (b_ih + b_hh)
    # wl_ref  [Hp, C*Ep]      bf16 fused (lang_encoder + residual chunk) weights
    # bl_ref  [1, C*Ep]       f32 fused bias
    # out_ref [TB, C*Ep]      f32 language codes (lane-dense)
    # xp_ref  [T, TB, 4*Hp]   f32 scratch: hoisted per-timestep gate pre-acts
    T, TB, Dl = xq_ref.shape
    Hp = whh_ref.shape[0]

    # Hoisted input projection: ONE [T*TB, Dl] x [Dl, 4Hp] bf16 matmul (f32 acc).
    xq = xq_ref[...].reshape(T * TB, Dl).astype(jnp.bfloat16)
    xp = jnp.dot(xq, wih_ref[...], preferred_element_type=jnp.float32) + bg_ref[...]
    xp_ref[...] = xp.reshape(T, TB, 4 * Hp)

    lens = len_ref[...]                       # [TB, 1] int32
    whh = whh_ref[...]                        # bf16, resident across the loop

    def step(t, carry):
        h, c = carry
        # One fused [TB,Hp]x[Hp,4Hp] matmul per step; lane-aligned gate slices.
        gates = xp_ref[t] + jnp.dot(h.astype(jnp.bfloat16), whh,
                                    preferred_element_type=jnp.float32)
        i = jax.nn.sigmoid(gates[:, 0 * Hp:1 * Hp])
        f = jax.nn.sigmoid(gates[:, 1 * Hp:2 * Hp])
        g = jnp.tanh(gates[:, 2 * Hp:3 * Hp])
        o = jax.nn.sigmoid(gates[:, 3 * Hp:4 * Hp])
        c_new = f * c + i * g
        h_new = o * jnp.tanh(c_new)
        valid = t < lens                      # emulates pack_padded_sequence
        return jnp.where(valid, h_new, h), jnp.where(valid, c_new, c)

    h0 = jnp.zeros((TB, Hp), jnp.float32)
    c0 = jnp.zeros((TB, Hp), jnp.float32)
    unroll = True if T <= 8 else 4
    h_last, _ = lax.fori_loop(0, T, step, (h0, c0), unroll=unroll)

    # Fused lang_encoder + lang_res_branch for all chunks in ONE matmul.
    out_ref[...] = (jnp.dot(h_last.astype(jnp.bfloat16), wl_ref[...],
                            preferred_element_type=jnp.float32) + bl_ref[...])


# ----------- kernel B: visual MLP + squared-L2 compare + masked pool ------- #

def _visual_compare_kernel(feat_ref, mask_ref, lang_ref,
                           vw1_ref, vb1_ref, vw2_ref, vb2_ref, out_ref):
    # feat_ref [R, Dv]   R = TILE_B * N visual rows (batch-major, chunk-minor)
    # mask_ref [R, 1]    f32 snippet mask (same flattening)
    # lang_ref [R, Ep]   f32 per-(batch, chunk) language codes (C == N)
    # vw1_ref  [Dv, Hv] bf16 ; vb1_ref [1, Hv] f32
    # vw2_ref  [Hv, Ep] bf16 ; vb2_ref [1, Ep] f32
    # out_ref  [TILE_B, 1]   pooled squared distances
    R, _ = feat_ref.shape
    TB = out_ref.shape[0]
    N = R // TB

    # Visual MLP (Linear -> ReLU -> Linear), bf16 MXU operands / f32 accumulate.
    x = feat_ref[...]
    if x.dtype != jnp.bfloat16:
        x = x.astype(jnp.bfloat16)
    h1 = jnp.dot(x, vw1_ref[...], preferred_element_type=jnp.float32) + vb1_ref[...]
    h1 = jnp.maximum(h1, 0.0)
    emb = jnp.dot(h1.astype(jnp.bfloat16), vw2_ref[...],
                  preferred_element_type=jnp.float32) + vb2_ref[...]
    # TODO(synk): nn.Dropout after the second Linear is identity (eval mode).

    # Squared-L2 compare against the language code of the matching chunk.
    diff = lang_ref[...] - emb
    d = jnp.sum(diff * diff, axis=-1, keepdims=True)            # [R, 1]

    # Masked mean pool over the N snippets of each batch row: segment-sum via a
    # tiny {0,1} selector matmul (avoids sublane<->lane reshapes entirely).
    m = mask_ref[...]                                            # [R, 1]
    row = lax.broadcasted_iota(jnp.int32, (TB, R), 1)
    col = lax.broadcasted_iota(jnp.int32, (TB, R), 0)
    sel = (row // N == col).astype(jnp.float32)                  # [TB, R]
    num = jnp.dot(sel, d * m, preferred_element_type=jnp.float32)
    den = jnp.dot(sel, m, preferred_element_type=jnp.float32)
    # Guard: all-masked rows give 0 (PyTorch reference would give NaN 0/0).
    out_ref[...] = num * pl.reciprocal(jnp.maximum(den, 1e-6), approx=True)


# ------------------------------ tile pickers -------------------------------- #

def _pick_query_tile(B_pad, T, Hp, Dl, budget_bytes=32 << 20):
    """Largest multiple-of-8 batch tile dividing B_pad under a VMEM budget."""
    per_b = T * (2 * Dl + 4 * Hp) * 4          # xq block (x2 buffers) + xp scratch
    cap = max(8, budget_bytes // max(per_b, 1))
    t = max(8, min(B_pad, (cap // 8) * 8))
    while B_pad % t:
        t -= 8
    return t


def _pick_visual_tile(B, N, Dv, itemsize, budget_bytes=16 << 20):
    """Largest multiple-of-8 batch tile dividing B under a VMEM budget."""
    per_b = 2 * N * Dv * itemsize              # double-buffered feature rows
    cap = max(1, budget_bytes // max(per_b, 1))
    t = (min(B, cap) // 8) * 8
    while t >= 8:
        if B % t == 0:
            return t
        t -= 8
    return B                                    # small B: single block


# ------------------------------ JAX wrapper --------------------------------- #

def smcn_talcv1_forward(params, padded_query, query_length,
                        visual_pos, visual_neg_intra=None, visual_neg_inter=None):
    C = params["num_chunks"]
    E_pad = params["embedding_pad"]
    H_pad = params["lang_hidden_pad"]

    def unpack(v):
        if v is None:
            return None, None
        assert len(v) == 2
        feat, mask = tuple(v.values())
        return feat, mask

    feat_p, mask_p = unpack(visual_pos)
    feat_ni, mask_ni = unpack(visual_neg_intra)
    feat_ne, mask_ne = unpack(visual_neg_inter)

    B, T, Dl = padded_query.shape

    # -------- language code: LSTM + fused (lang + residual chunks) ---------
    B_pad = _round_up(B, 8)
    xq = jnp.transpose(padded_query, (1, 0, 2))                  # [T, B, Dl]
    if B_pad != B:
        xq = jnp.pad(xq, ((0, 0), (0, B_pad - B), (0, 0)))
    lens = jnp.pad(jnp.asarray(query_length, jnp.int32),
                   (0, B_pad - B)).reshape(B_pad, 1)

    wih, whh, bg = params["lstm_wih"], params["lstm_whh"], params["lstm_bg"]
    wl, bl = params["lang_w_all"], params["lang_b_all"]

    TILE_QB = _pick_query_tile(B_pad, T, H_pad, Dl)
    lang_out = pl.pallas_call(
        _query_lstm_kernel,
        out_shape=jax.ShapeDtypeStruct((B_pad, C * E_pad), jnp.float32),
        grid=(B_pad // TILE_QB,),
        in_specs=[
            pl.BlockSpec((T, TILE_QB, Dl), lambda b: (0, b, 0)),
            pl.BlockSpec((TILE_QB, 1), lambda b: (b, 0)),
            pl.BlockSpec(wih.shape, lambda b: (0, 0)),
            pl.BlockSpec(whh.shape, lambda b: (0, 0)),
            pl.BlockSpec(bg.shape, lambda b: (0, 0)),
            pl.BlockSpec(wl.shape, lambda b: (0, 0)),
            pl.BlockSpec(bl.shape, lambda b: (0, 0)),
        ],
        out_specs=pl.BlockSpec((TILE_QB, C * E_pad), lambda b: (b, 0)),
        scratch_shapes=[pltpu.VMEM((T, TILE_QB, 4 * H_pad), jnp.float32)],
        compiler_params=pltpu.CompilerParams(
            dimension_semantics=("parallel",), vmem_limit_bytes=_VMEM_LIMIT),
    )(xq, lens, wih, whh, bg, wl, bl)
    # [B, C, Ep] flattened to rows (batch-major, chunk-minor) to match features.
    lang_flat = lang_out[:B].reshape(B * C, E_pad)

    # -------- per-branch visual MLP + compare + masked mean pool -----------
    vw1, vb1 = params["v_w1"], params["v_b1"]
    vw2, vb2 = params["v_w2"], params["v_b2"]

    def run_branch(feat, mask):
        Bf, N, Dv = feat.shape
        assert Bf == B and N == C, "snippet count must equal num_chunks"
        TILE_B = _pick_visual_tile(Bf, N, Dv, feat.dtype.itemsize)
        feat2 = feat.reshape(Bf * N, Dv)                       # free view
        mask2 = mask.astype(jnp.float32).reshape(Bf * N, 1)
        out = pl.pallas_call(
            _visual_compare_kernel,
            out_shape=jax.ShapeDtypeStruct((Bf, 1), jnp.float32),
            grid=(Bf // TILE_B,),
            in_specs=[
                pl.BlockSpec((TILE_B * N, Dv), lambda b: (b, 0)),
                pl.BlockSpec((TILE_B * N, 1), lambda b: (b, 0)),
                pl.BlockSpec((TILE_B * C, E_pad), lambda b: (b, 0)),
                pl.BlockSpec(vw1.shape, lambda b: (0, 0)),
                pl.BlockSpec(vb1.shape, lambda b: (0, 0)),
                pl.BlockSpec(vw2.shape, lambda b: (0, 0)),
                pl.BlockSpec(vb2.shape, lambda b: (0, 0)),
            ],
            out_specs=pl.BlockSpec((TILE_B, 1), lambda b: (b, 0)),
            compiler_params=pltpu.CompilerParams(
                dimension_semantics=("parallel",), vmem_limit_bytes=_VMEM_LIMIT),
        )(feat2, mask2, lang_flat, vw1, vb1, vw2, vb2)
        return out.reshape(Bf)

    c_pos = run_branch(feat_p, mask_p)
    c_neg_intra = run_branch(feat_ni, mask_ni) if feat_ni is not None else None
    c_neg_inter = run_branch(feat_ne, mask_ne) if feat_ne is not None else None
    return c_pos, c_neg_intra, c_neg_inter


# ------------------------------ parameters ---------------------------------- #

def pack_params(raw, lang_hidden, embedding_size, num_chunks):
    """Repack PyTorch-style (in, out) parameters into the fused kernel layout.

    * H and E are zero-padded to multiples of 128 (lane-aligned gate slices /
      lane-dense language codes); padding contributes exactly 0 everywhere.
    * lang_encoder is folded into lang_res_branch (W_fused[c] = lang_w + res_w_c).
    * Matmul weights are stored in bf16 (MXU operands); biases stay f32.
    """
    H, E, C = lang_hidden, embedding_size, num_chunks
    H_pad = _round_up(H, 128)
    E_pad = _round_up(E, 128)

    def repack_gates(w, pad_rows=None):
        # w: [In, 4H] -> per-gate zero-pad H->H_pad -> [In(_pad), 4*H_pad]
        outs = [jnp.pad(w[:, k * H:(k + 1) * H], ((0, 0), (0, H_pad - H)))
                for k in range(4)]
        out = jnp.concatenate(outs, axis=1)
        if pad_rows is not None and pad_rows != out.shape[0]:
            out = jnp.pad(out, ((0, pad_rows - out.shape[0]), (0, 0)))
        return out

    wih_p = repack_gates(raw["lstm_wih"])                      # [Dl, 4*H_pad]
    whh_p = repack_gates(raw["lstm_whh"], H_pad)               # [H_pad, 4*H_pad]
    bg_p = repack_gates(raw["lstm_b"])                         # [1, 4*H_pad]

    wl_blocks, bl_blocks = [], []
    for c in range(C):
        wc = raw["lang_w"] + raw["res_w"][:, c * E:(c + 1) * E]   # [H, E]
        bc = raw["lang_b"] + raw["res_b"][:, c * E:(c + 1) * E]   # [1, E]
        wl_blocks.append(jnp.pad(wc, ((0, H_pad - H), (0, E_pad - E))))
        bl_blocks.append(jnp.pad(bc, ((0, 0), (0, E_pad - E))))
    wl_all = jnp.concatenate(wl_blocks, axis=1)                # [H_pad, C*E_pad]
    bl_all = jnp.concatenate(bl_blocks, axis=1)                # [1, C*E_pad]

    v_w2 = jnp.pad(raw["v_w2"], ((0, 0), (0, E_pad - E)))
    v_b2 = jnp.pad(raw["v_b2"], ((0, 0), (0, E_pad - E)))

    return dict(
        v_w1=raw["v_w1"].astype(jnp.bfloat16),
        v_b1=raw["v_b1"].astype(jnp.float32),
        v_w2=v_w2.astype(jnp.bfloat16),
        v_b2=v_b2.astype(jnp.float32),
        lstm_wih=wih_p.astype(jnp.bfloat16),
        lstm_whh=whh_p.astype(jnp.bfloat16),
        lstm_bg=bg_p.astype(jnp.float32),
        lang_w_all=wl_all.astype(jnp.bfloat16),
        lang_b_all=bl_all.astype(jnp.float32),
        num_chunks=C, embedding_pad=E_pad, lang_hidden_pad=H_pad,
    )


def init_params(key, visual_size, visual_hidden, embedding_size,
                lang_size, lang_hidden, num_chunks):
    # Matches MCN.init_parameters(): weights ~ U(-0.08, 0.08), biases = 0.
    ks = jax.random.split(key, 6)
    u = lambda k, shape: jax.random.uniform(k, shape, jnp.float32, -0.08, 0.08)
    raw = dict(
        v_w1=u(ks[0], (visual_size, visual_hidden)),
        v_b1=jnp.zeros((1, visual_hidden), jnp.float32),
        v_w2=u(ks[1], (visual_hidden, embedding_size)),
        v_b2=jnp.zeros((1, embedding_size), jnp.float32),
        # LSTM gate order i, f, g, o packed along the output dim (PyTorch order).
        lstm_wih=u(ks[2], (lang_size, 4 * lang_hidden)),
        lstm_whh=u(ks[3], (lang_hidden, 4 * lang_hidden)),
        lstm_b=jnp.zeros((1, 4 * lang_hidden), jnp.float32),    # b_ih + b_hh
        lang_w=u(ks[4], (lang_hidden, embedding_size)),
        lang_b=jnp.zeros((1, embedding_size), jnp.float32),
        res_w=u(ks[5], (lang_hidden, num_chunks * embedding_size)),
        res_b=jnp.zeros((1, num_chunks * embedding_size), jnp.float32),
    )
    return pack_params(raw, lang_hidden, embedding_size, num_chunks)


if __name__ == "__main__":
    # Small shapes consistent with the module: N snippets == num_chunks.
    B, T = 2, 8
    num_chunks = 6
    N = num_chunks
    visual_size, visual_hidden, embedding_size = 32, 16, 8
    lang_size, lang_hidden = 16, 32

    key = jax.random.PRNGKey(0)
    kp, k1, k2, k3, k4 = jax.random.split(key, 5)
    params = init_params(kp, visual_size, visual_hidden, embedding_size,
                         lang_size, lang_hidden, num_chunks)

    padded_query = jax.random.normal(k1, (B, T, lang_size), jnp.float32)
    query_length = jnp.array([8, 5], jnp.int32)   # sorted descending

    feat_p = jax.random.normal(k2, (B, N, visual_size), jnp.float32)
    mask_p = jnp.ones((B, N), jnp.float32)
    feat_ni = jax.random.normal(k3, (B, N, visual_size), jnp.float32)
    mask_ni = jnp.concatenate([jnp.ones((B, 4)), jnp.zeros((B, 2))],
                              axis=1).astype(jnp.float32)
    feat_ne = jax.random.normal(k4, (B, N, visual_size), jnp.float32)
    mask_ne = jnp.ones((B, N), jnp.float32)

    c_pos, c_neg_intra, c_neg_inter = smcn_talcv1_forward(
        params, padded_query, query_length,
        {"features": feat_p, "mask": mask_p},
        {"features": feat_ni, "mask": mask_ni},
        {"features": feat_ne, "mask": mask_ne},
    )
    jax.block_until_ready((c_pos, c_neg_intra, c_neg_inter))
    assert c_pos.shape == (B,)
    assert c_neg_intra.shape == (B,)
    assert c_neg_inter.shape == (B,)
    print("KERNEL_OK")
</pallas_src>

<mosaic_0001>
module attributes {stable_mosaic.version = 11 : i64} {
  func.func @_query_lstm_kernel(%arg0: i32, %arg1: memref<8x8x16xf32, #tpu.memory_space<vmem>>, %arg2: memref<8x1xi32, #tpu.memory_space<vmem>>, %arg3: memref<16x512xbf16, #tpu.memory_space<vmem>>, %arg4: memref<128x512xbf16, #tpu.memory_space<vmem>>, %arg5: memref<1x512xf32, #tpu.memory_space<vmem>>, %arg6: memref<128x768xbf16, #tpu.memory_space<vmem>>, %arg7: memref<1x768xf32, #tpu.memory_space<vmem>>, %arg8: memref<8x768xf32, #tpu.memory_space<vmem>>, %arg9: memref<8x8x512xf32, #tpu.memory_space<vmem>>) attributes {dimension_semantics = [#tpu.dimension_semantics<parallel>], iteration_bounds = array<i64: 1>, scalar_prefetch = 0 : i64, scratch_operands = 1 : i64, tpu.core_type = #tpu.core_type<tc>, window_params = [{transform_indices = @transform_0, window_bounds = array<i64: 8, 8, 16>}, {transform_indices = @transform_1, window_bounds = array<i64: 8, 1>}, {pipeline_mode = #tpu.pipeline_mode<synchronous>, transform_indices = @transform_2, window_bounds = array<i64: 16, 512>}, {pipeline_mode = #tpu.pipeline_mode<synchronous>, transform_indices = @transform_3, window_bounds = array<i64: 128, 512>}, {pipeline_mode = #tpu.pipeline_mode<synchronous>, transform_indices = @transform_4, window_bounds = array<i64: 1, 512>}, {pipeline_mode = #tpu.pipeline_mode<synchronous>, transform_indices = @transform_5, window_bounds = array<i64: 128, 768>}, {pipeline_mode = #tpu.pipeline_mode<synchronous>, transform_indices = @transform_6, window_bounds = array<i64: 1, 768>}, {transform_indices = @transform_7, window_bounds = array<i64: 8, 768>}]} {
    %c0 = arith.constant 0 : index
    %c0_0 = arith.constant 0 : index
    %c0_1 = arith.constant 0 : index
    %0 = vector.load %arg1[%c0, %c0_0, %c0_1] : memref<8x8x16xf32, #tpu.memory_space<vmem>>, vector<8x8x16xf32>
    %1 = vector.shape_cast %0 : vector<8x8x16xf32> to vector<64x16xf32>
    %2 = arith.truncf %1 : vector<64x16xf32> to vector<64x16xbf16>
    %c0_2 = arith.constant 0 : index
    %c0_3 = arith.constant 0 : index
    %3 = vector.load %arg3[%c0_2, %c0_3] : memref<16x512xbf16, #tpu.memory_space<vmem>>, vector<16x512xbf16>
    %cst = arith.constant dense<0.000000e+00> : vector<64x512xf32>
    %4 = tpu.matmul %2, %3, %cst {dimension_numbers = #tpu.dot_dimension_numbers<[1], [0], [0], [1], [0, 0, 1, 1], [], []>} : vector<64x16xbf16>, vector<16x512xbf16>, vector<64x512xf32> -> vector<64x512xf32>
    %c0_4 = arith.constant 0 : index
    %c0_5 = arith.constant 0 : index
    %5 = vector.load %arg5[%c0_4, %c0_5] : memref<1x512xf32, #tpu.memory_space<vmem>>, vector<1x512xf32>
    %6 = vector.broadcast %5 : vector<1x512xf32> to vector<64x512xf32>
    %7 = arith.addf %4, %6 : vector<64x512xf32>
    %8 = vector.shape_cast %7 : vector<64x512xf32> to vector<8x8x512xf32>
    %c0_6 = arith.constant 0 : index
    %c0_7 = arith.constant 0 : index
    %c0_8 = arith.constant 0 : index
    %9 = vector.load %arg9[%c0_6, %c0_7, %c0_8] : memref<8x8x512xf32, #tpu.memory_space<vmem>>, vector<8x8x512xf32>
    tpu.vector_store %arg9[%c0_6, %c0_7, %c0_8], %8 {strides = array<i32>} : memref<8x8x512xf32, #tpu.memory_space<vmem>>, vector<8x8x512xf32>,
    %c0_9 = arith.constant 0 : index
    %c0_10 = arith.constant 0 : index
    %10 = vector.load %arg2[%c0_9, %c0_10] : memref<8x1xi32, #tpu.memory_space<vmem>>, vector<8x1xi32>
    %c0_11 = arith.constant 0 : index
    %c0_12 = arith.constant 0 : index
    %11 = vector.load %arg4[%c0_11, %c0_12] : memref<128x512xbf16, #tpu.memory_space<vmem>>, vector<128x512xbf16>
    %cst_13 = arith.constant 0.000000e+00 : f32
    %12 = vector.broadcast %cst_13 : f32 to vector<8x128xf32>
    %cst_14 = arith.constant 0.000000e+00 : f32
    %13 = vector.broadcast %cst_14 : f32 to vector<8x128xf32>
    %c0_i32 = arith.constant 0 : i32
    %14 = arith.index_cast %c0_i32 : i32 to index
    %c0_15 = arith.constant 0 : index
    %c0_16 = arith.constant 0 : index
    %15 = vector.load %arg9[%14, %c0_15, %c0_16] : memref<8x8x512xf32, #tpu.memory_space<vmem>>, vector<1x8x512xf32>
    %16 = vector.shape_cast %15 : vector<1x8x512xf32> to vector<8x512xf32>
    %17 = arith.truncf %12 : vector<8x128xf32> to vector<8x128xbf16>
    %cst_17 = arith.constant dense<0.000000e+00> : vector<8x512xf32>
    %18 = tpu.matmul %17, %11, %cst_17 {dimension_numbers = #tpu.dot_dimension_numbers<[1], [0], [0], [1], [0, 0, 1, 1], [], []>} : vector<8x128xbf16>, vector<128x512xbf16>, vector<8x512xf32> -> vector<8x512xf32>
    %19 = arith.addf %16, %18 : vector<8x512xf32>
    %20 = vector.extract_strided_slice %19 {offsets = [0, 0], sizes = [8, 128], strides = [1, 1]} : vector<8x512xf32> to vector<8x128xf32>
    %21 = arith.negf %20 : vector<8x128xf32>
    %22 = math.exp %21 : vector<8x128xf32>
    %cst_18 = arith.constant 1.000000e+00 : f32
    %23 = vector.broadcast %cst_18 : f32 to vector<8x128xf32>
    %24 = arith.addf %23, %22 : vector<8x128xf32>
    %25 = arith.divf %23, %24 : vector<8x128xf32>
    %26 = vector.extract_strided_slice %19 {offsets = [0, 128], sizes = [8, 128], strides = [1, 1]} : vector<8x512xf32> to vector<8x128xf32>
    %27 = arith.negf %26 : vector<8x128xf32>
    %28 = math.exp %27 : vector<8x128xf32>
    %cst_19 = arith.constant 1.000000e+00 : f32
    %29 = vector.broadcast %cst_19 : f32 to vector<8x128xf32>
    %30 = arith.addf %29, %28 : vector<8x128xf32>
    %31 = arith.divf %29, %30 : vector<8x128xf32>
    %32 = vector.extract_strided_slice %19 {offsets = [0, 256], sizes = [8, 128], strides = [1, 1]} : vector<8x512xf32> to vector<8x128xf32>
    %33 = math.tanh %32 : vector<8x128xf32>
    %34 = vector.extract_strided_slice %19 {offsets = [0, 384], sizes = [8, 128], strides = [1, 1]} : vector<8x512xf32> to vector<8x128xf32>
    %35 = arith.negf %34 : vector<8x128xf32>
    %36 = math.exp %35 : vector<8x128xf32>
    %cst_20 = arith.constant 1.000000e+00 : f32
    %37 = vector.broadcast %cst_20 : f32 to vector<8x128xf32>
    %38 = arith.addf %37, %36 : vector<8x128xf32>
    %39 = arith.divf %37, %38 : vector<8x128xf32>
    %40 = arith.mulf %31, %13 : vector<8x128xf32>
    %41 = arith.mulf %25, %33 : vector<8x128xf32>
    %42 = arith.addf %40, %41 : vector<8x128xf32>
    %43 = math.tanh %42 : vector<8x128xf32>
    %44 = arith.mulf %39, %43 : vector<8x128xf32>
    %45 = vector.broadcast %c0_i32 : i32 to vector<8x1xi32>
    %46 = arith.cmpi slt, %45, %10 : vector<8x1xi32>
    %47 = vector.shape_cast %46 : vector<8x1xi1> to vector<8x1xi1>
    %48 = vector.broadcast %47 : vector<8x1xi1> to vector<8x128xi1>
    %49 = arith.select %48, %44, %12 : vector<8x128xi1>, vector<8x128xf32>
    %50 = vector.shape_cast %46 : vector<8x1xi1> to vector<8x1xi1>
    %51 = vector.broadcast %50 : vector<8x1xi1> to vector<8x128xi1>
    %52 = arith.select %51, %42, %13 : vector<8x128xi1>, vector<8x128xf32>
    %c1_i32 = arith.constant 1 : i32
    %53 = arith.index_cast %c1_i32 : i32 to index
    %c0_21 = arith.constant 0 : index
    %c0_22 = arith.constant 0 : index
    %54 = vector.load %arg9[%53, %c0_21, %c0_22] : memref<8x8x512xf32, #tpu.memory_space<vmem>>, vector<1x8x512xf32>
    %55 = vector.shape_cast %54 : vector<1x8x512xf32> to vector<8x512xf32>
    %56 = arith.truncf %49 : vector<8x128xf32> to vector<8x128xbf16>
    %cst_23 = arith.constant dense<0.000000e+00> : vector<8x512xf32>
    %57 = tpu.matmul %56, %11, %cst_23 {dimension_numbers = #tpu.dot_dimension_numbers<[1], [0], [0], [1], [0, 0, 1, 1], [], []>} : vector<8x128xbf16>, vector<128x512xbf16>, vector<8x512xf32> -> vector<8x512xf32>
    %58 = arith.addf %55, %57 : vector<8x512xf32>
    %59 = vector.extract_strided_slice %58 {offsets = [0, 0], sizes = [8, 128], strides = [1, 1]} : vector<8x512xf32> to vector<8x128xf32>
    %60 = arith.negf %59 : vector<8x128xf32>
    %61 = math.exp %60 : vector<8x128xf32>
    %cst_24 = arith.constant 1.000000e+00 : f32
    %62 = vector.broadcast %cst_24 : f32 to vector<8x128xf32>
    %63 = arith.addf %62, %61 : vector<8x128xf32>
    %64 = arith.divf %62, %63 : vector<8x128xf32>
    %65 = vector.extract_strided_slice %58 {offsets = [0, 128], sizes = [8, 128], strides = [1, 1]} : vector<8x512xf32> to vector<8x128xf32>
    %66 = arith.negf %65 : vector<8x128xf32>
    %67 = math.exp %66 : vector<8x128xf32>
    %cst_25 = arith.constant 1.000000e+00 : f32
    %68 = vector.broadcast %cst_25 : f32 to vector<8x128xf32>
    %69 = arith.addf %68, %67 : vector<8x128xf32>
    %70 = arith.divf %68, %69 : vector<8x128xf32>
    %71 = vector.extract_strided_slice %58 {offsets = [0, 256], sizes = [8, 128], strides = [1, 1]} : vector<8x512xf32> to vector<8x128xf32>
    %72 = math.tanh %71 : vector<8x128xf32>
    %73 = vector.extract_strided_slice %58 {offsets = [0, 384], sizes = [8, 128], strides = [1, 1]} : vector<8x512xf32> to vector<8x128xf32>
    %74 = arith.negf %73 : vector<8x128xf32>
    %75 = math.exp %74 : vector<8x128xf32>
    %cst_26 = arith.constant 1.000000e+00 : f32
    %76 = vector.broadcast %cst_26 : f32 to vector<8x128xf32>
    %77 = arith.addf %76, %75 : vector<8x128xf32>
    %78 = arith.divf %76, %77 : vector<8x128xf32>
    %79 = arith.mulf %70, %52 : vector<8x128xf32>
    %80 = arith.mulf %64, %72 : vector<8x128xf32>
    %81 = arith.addf %79, %80 : vector<8x128xf32>
    %82 = math.tanh %81 : vector<8x128xf32>
    %83 = arith.mulf %78, %82 : vector<8x128xf32>
    %84 = vector.broadcast %c1_i32 : i32 to vector<8x1xi32>
    %85 = arith.cmpi slt, %84, %10 : vector<8x1xi32>
    %86 = vector.shape_cast %85 : vector<8x1xi1> to vector<8x1xi1>
    %87 = vector.broadcast %86 : vector<8x1xi1> to vector<8x128xi1>
    %88 = arith.select %87, %83, %49 : vector<8x128xi1>, vector<8x128xf32>
    %89 = vector.shape_cast %85 : vector<8x1xi1> to vector<8x1xi1>
    %90 = vector.broadcast %89 : vector<8x1xi1> to vector<8x128xi1>
    %91 = arith.select %90, %81, %52 : vector<8x128xi1>, vector<8x128xf32>
    %c2_i32 = arith.constant 2 : i32
    %92 = arith.index_cast %c2_i32 : i32 to index
    %c0_27 = arith.constant 0 : index
    %c0_28 = arith.constant 0 : index
    %93 = vector.load %arg9[%92, %c0_27, %c0_28] : memref<8x8x512xf32, #tpu.memory_space<vmem>>, vector<1x8x512xf32>
    %94 = vector.shape_cast %93 : vector<1x8x512xf32> to vector<8x512xf32>
    %95 = arith.truncf %88 : vector<8x128xf32> to vector<8x128xbf16>
    %cst_29 = arith.constant dense<0.000000e+00> : vector<8x512xf32>
    %96 = tpu.matmul %95, %11, %cst_29 {dimension_numbers = #tpu.dot_dimension_numbers<[1], [0], [0], [1], [0, 0, 1, 1], [], []>} : vector<8x128xbf16>, vector<128x512xbf16>, vector<8x512xf32> -> vector<8x512xf32>
    %97 = arith.addf %94, %96 : vector<8x512xf32>
    %98 = vector.extract_strided_slice %97 {offsets = [0, 0], sizes = [8, 128], strides = [1, 1]} : vector<8x512xf32> to vector<8x128xf32>
    %99 = arith.negf %98 : vector<8x128xf32>
    %100 = math.exp %99 : vector<8x128xf32>
    %cst_30 = arith.constant 1.000000e+00 : f32
    %101 = vector.broadcast %cst_30 : f32 to vector<8x128xf32>
    %102 = arith.addf %101, %100 : vector<8x128xf32>
    %103 = arith.divf %101, %102 : vector<8x128xf32>
    %104 = vector.extract_strided_slice %97 {offsets = [0, 128], sizes = [8, 128], strides = [1, 1]} : vector<8x512xf32> to vector<8x128xf32>
    %105 = arith.negf %104 : vector<8x128xf32>
    %106 = math.exp %105 : vector<8x128xf32>
    %cst_31 = arith.constant 1.000000e+00 : f32
    %107 = vector.broadcast %cst_31 : f32 to vector<8x128xf32>
    %108 = arith.addf %107, %106 : vector<8x128xf32>
    %109 = arith.divf %107, %108 : vector<8x128xf32>
    %110 = vector.extract_strided_slice %97 {offsets = [0, 256], sizes = [8, 128], strides = [1, 1]} : vector<8x512xf32> to vector<8x128xf32>
    %111 = math.tanh %110 : vector<8x128xf32>
    %112 = vector.extract_strided_slice %97 {offsets = [0, 384], sizes = [8, 128], strides = [1, 1]} : vector<8x512xf32> to vector<8x128xf32>
    %113 = arith.negf %112 : vector<8x128xf32>
    %114 = math.exp %113 : vector<8x128xf32>
    %cst_32 = arith.constant 1.000000e+00 : f32
    %115 = vector.broadcast %cst_32 : f32 to vector<8x128xf32>
    %116 = arith.addf %115, %114 : vector<8x128xf32>
    %117 = arith.divf %115, %116 : vector<8x128xf32>
    %118 = arith.mulf %109, %91 : vector<8x128xf32>
    %119 = arith.mulf %103, %111 : vector<8x128xf32>
    %120 = arith.addf %118, %119 : vector<8x128xf32>
    %121 = math.tanh %120 : vector<8x128xf32>
    %122 = arith.mulf %117, %121 : vector<8x128xf32>
    %123 = vector.broadcast %c2_i32 : i32 to vector<8x1xi32>
    %124 = arith.cmpi slt, %123, %10 : vector<8x1xi32>
    %125 = vector.shape_cast %124 : vector<8x1xi1> to vector<8x1xi1>
    %126 = vector.broadcast %125 : vector<8x1xi1> to vector<8x128xi1>
    %127 = arith.select %126, %122, %88 : vector<8x128xi1>, vector<8x128xf32>
    %128 = vector.shape_cast %124 : vector<8x1xi1> to vector<8x1xi1>
    %129 = vector.broadcast %128 : vector<8x1xi1> to vector<8x128xi1>
    %130 = arith.select %129, %120, %91 : vector<8x128xi1>, vector<8x128xf32>
    %c3_i32 = arith.constant 3 : i32
    %131 = arith.index_cast %c3_i32 : i32 to index
    %c0_33 = arith.constant 0 : index
    %c0_34 = arith.constant 0 : index
    %132 = vector.load %arg9[%131, %c0_33, %c0_34] : memref<8x8x512xf32, #tpu.memory_space<vmem>>, vector<1x8x512xf32>
    %133 = vector.shape_cast %132 : vector<1x8x512xf32> to vector<8x512xf32>
    %134 = arith.truncf %127 : vector<8x128xf32> to vector<8x128xbf16>
    %cst_35 = arith.constant dense<0.000000e+00> : vector<8x512xf32>
    %135 = tpu.matmul %134, %11, %cst_35 {dimension_numbers = #tpu.dot_dimension_numbers<[1], [0], [0], [1], [0, 0, 1, 1], [], []>} : vector<8x128xbf16>, vector<128x512xbf16>, vector<8x512xf32> -> vector<8x512xf32>
    %136 = arith.addf %133, %135 : vector<8x512xf32>
    %137 = vector.extract_strided_slice %136 {offsets = [0, 0], sizes = [8, 128], strides = [1, 1]} : vector<8x512xf32> to vector<8x128xf32>
    %138 = arith.negf %137 : vector<8x128xf32>
    %139 = math.exp %138 : vector<8x128xf32>
    %cst_36 = arith.constant 1.000000e+00 : f32
    %140 = vector.broadcast %cst_36 : f32 to vector<8x128xf32>
    %141 = arith.addf %140, %139 : vector<8x128xf32>
    %142 = arith.divf %140, %141 : vector<8x128xf32>
    %143 = vector.extract_strided_slice %136 {offsets = [0, 128], sizes = [8, 128], strides = [1, 1]} : vector<8x512xf32> to vector<8x128xf32>
    %144 = arith.negf %143 : vector<8x128xf32>
    %145 = math.exp %144 : vector<8x128xf32>
    %cst_37 = arith.constant 1.000000e+00 : f32
    %146 = vector.broadcast %cst_37 : f32 to vector<8x128xf32>
    %147 = arith.addf %146, %145 : vector<8x128xf32>
    %148 = arith.divf %146, %147 : vector<8x128xf32>
    %149 = vector.extract_strided_slice %136 {offsets = [0, 256], sizes = [8, 128], strides = [1, 1]} : vector<8x512xf32> to vector<8x128xf32>
    %150 = math.tanh %149 : vector<8x128xf32>
    %151 = vector.extract_strided_slice %136 {offsets = [0, 384], sizes = [8, 128], strides = [1, 1]} : vector<8x512xf32> to vector<8x128xf32>
    %152 = arith.negf %151 : vector<8x128xf32>
    %153 = math.exp %152 : vector<8x128xf32>
    %cst_38 = arith.constant 1.000000e+00 : f32
    %154 = vector.broadcast %cst_38 : f32 to vector<8x128xf32>
    %155 = arith.addf %154, %153 : vector<8x128xf32>
    %156 = arith.divf %154, %155 : vector<8x128xf32>
    %157 = arith.mulf %148, %130 : vector<8x128xf32>
    %158 = arith.mulf %142, %150 : vector<8x128xf32>
    %159 = arith.addf %157, %158 : vector<8x128xf32>
    %160 = math.tanh %159 : vector<8x128xf32>
    %161 = arith.mulf %156, %160 : vector<8x128xf32>
    %162 = vector.broadcast %c3_i32 : i32 to vector<8x1xi32>
    %163 = arith.cmpi slt, %162, %10 : vector<8x1xi32>
    %164 = vector.shape_cast %163 : vector<8x1xi1> to vector<8x1xi1>
    %165 = vector.broadcast %164 : vector<8x1xi1> to vector<8x128xi1>
    %166 = arith.select %165, %161, %127 : vector<8x128xi1>, vector<8x128xf32>
    %167 = vector.shape_cast %163 : vector<8x1xi1> to vector<8x1xi1>
    %168 = vector.broadcast %167 : vector<8x1xi1> to vector<8x128xi1>
    %169 = arith.select %168, %159, %130 : vector<8x128xi1>, vector<8x128xf32>
    %c4_i32 = arith.constant 4 : i32
    %170 = arith.index_cast %c4_i32 : i32 to index
    %c0_39 = arith.constant 0 : index
    %c0_40 = arith.constant 0 : index
    %171 = vector.load %arg9[%170, %c0_39, %c0_40] : memref<8x8x512xf32, #tpu.memory_space<vmem>>, vector<1x8x512xf32>
    %172 = vector.shape_cast %171 : vector<1x8x512xf32> to vector<8x512xf32>
    %173 = arith.truncf %166 : vector<8x128xf32> to vector<8x128xbf16>
    %cst_41 = arith.constant dense<0.000000e+00> : vector<8x512xf32>
    %174 = tpu.matmul %173, %11, %cst_41 {dimension_numbers = #tpu.dot_dimension_numbers<[1], [0], [0], [1], [0, 0, 1, 1], [], []>} : vector<8x128xbf16>, vector<128x512xbf16>, vector<8x512xf32> -> vector<8x512xf32>
    %175 = arith.addf %172, %174 : vector<8x512xf32>
    %176 = vector.extract_strided_slice %175 {offsets = [0, 0], sizes = [8, 128], strides = [1, 1]} : vector<8x512xf32> to vector<8x128xf32>
    %177 = arith.negf %176 : vector<8x128xf32>
    %178 = math.exp %177 : vector<8x128xf32>
    %cst_42 = arith.constant 1.000000e+00 : f32
    %179 = vector.broadcast %cst_42 : f32 to vector<8x128xf32>
    %180 = arith.addf %179, %178 : vector<8x128xf32>
    %181 = arith.divf %179, %180 : vector<8x128xf32>
    %182 = vector.extract_strided_slice %175 {offsets = [0, 128], sizes = [8, 128], strides = [1, 1]} : vector<8x512xf32> to vector<8x128xf32>
    %183 = arith.negf %182 : vector<8x128xf32>
    %184 = math.exp %183 : vector<8x128xf32>
    %cst_43 = arith.constant 1.000000e+00 : f32
    %185 = vector.broadcast %cst_43 : f32 to vector<8x128xf32>
    %186 = arith.addf %185, %184 : vector<8x128xf32>
    %187 = arith.divf %185, %186 : vector<8x128xf32>
    %188 = vector.extract_strided_slice %175 {offsets = [0, 256], sizes = [8, 128], strides = [1, 1]} : vector<8x512xf32> to vector<8x128xf32>
    %189 = math.tanh %188 : vector<8x128xf32>
    %190 = vector.extract_strided_slice %175 {offsets = [0, 384], sizes = [8, 128], strides = [1, 1]} : vector<8x512xf32> to vector<8x128xf32>
    %191 = arith.negf %190 : vector<8x128xf32>
    %192 = math.exp %191 : vector<8x128xf32>
    %cst_44 = arith.constant 1.000000e+00 : f32
    %193 = vector.broadcast %cst_44 : f32 to vector<8x128xf32>
    %194 = arith.addf %193, %192 : vector<8x128xf32>
    %195 = arith.divf %193, %194 : vector<8x128xf32>
    %196 = arith.mulf %187, %169 : vector<8x128xf32>
    %197 = arith.mulf %181, %189 : vector<8x128xf32>
    %198 = arith.addf %196, %197 : vector<8x128xf32>
    %199 = math.tanh %198 : vector<8x128xf32>
    %200 = arith.mulf %195, %199 : vector<8x128xf32>
    %201 = vector.broadcast %c4_i32 : i32 to vector<8x1xi32>
    %202 = arith.cmpi slt, %201, %10 : vector<8x1xi32>
    %203 = vector.shape_cast %202 : vector<8x1xi1> to vector<8x1xi1>
    %204 = vector.broadcast %203 : vector<8x1xi1> to vector<8x128xi1>
    %205 = arith.select %204, %200, %166 : vector<8x128xi1>, vector<8x128xf32>
    %206 = vector.shape_cast %202 : vector<8x1xi1> to vector<8x1xi1>
    %207 = vector.broadcast %206 : vector<8x1xi1> to vector<8x128xi1>
    %208 = arith.select %207, %198, %169 : vector<8x128xi1>, vector<8x128xf32>
    %c5_i32 = arith.constant 5 : i32
    %209 = arith.index_cast %c5_i32 : i32 to index
    %c0_45 = arith.constant 0 : index
    %c0_46 = arith.constant 0 : index
    %210 = vector.load %arg9[%209, %c0_45, %c0_46] : memref<8x8x512xf32, #tpu.memory_space<vmem>>, vector<1x8x512xf32>
    %211 = vector.shape_cast %210 : vector<1x8x512xf32> to vector<8x512xf32>
    %212 = arith.truncf %205 : vector<8x128xf32> to vector<8x128xbf16>
    %cst_47 = arith.constant dense<0.000000e+00> : vector<8x512xf32>
    %213 = tpu.matmul %212, %11, %cst_47 {dimension_numbers = #tpu.dot_dimension_numbers<[1], [0], [0], [1], [0, 0, 1, 1], [], []>} : vector<8x128xbf16>, vector<128x512xbf16>, vector<8x512xf32> -> vector<8x512xf32>
    %214 = arith.addf %211, %213 : vector<8x512xf32>
    %215 = vector.extract_strided_slice %214 {offsets = [0, 0], sizes = [8, 128], strides = [1, 1]} : vector<8x512xf32> to vector<8x128xf32>
    %216 = arith.negf %215 : vector<8x128xf32>
    %217 = math.exp %216 : vector<8x128xf32>
    %cst_48 = arith.constant 1.000000e+00 : f32
    %218 = vector.broadcast %cst_48 : f32 to vector<8x128xf32>
    %219 = arith.addf %218, %217 : vector<8x128xf32>
    %220 = arith.divf %218, %219 : vector<8x128xf32>
    %221 = vector.extract_strided_slice %214 {offsets = [0, 128], sizes = [8, 128], strides = [1, 1]} : vector<8x512xf32> to vector<8x128xf32>
    %222 = arith.negf %221 : vector<8x128xf32>
    %223 = math.exp %222 : vector<8x128xf32>
    %cst_49 = arith.constant 1.000000e+00 : f32
    %224 = vector.broadcast %cst_49 : f32 to vector<8x128xf32>
    %225 = arith.addf %224, %223 : vector<8x128xf32>
    %226 = arith.divf %224, %225 : vector<8x128xf32>
    %227 = vector.extract_strided_slice %214 {offsets = [0, 256], sizes = [8, 128], strides = [1, 1]} : vector<8x512xf32> to vector<8x128xf32>
    %228 = math.tanh %227 : vector<8x128xf32>
    %229 = vector.extract_strided_slice %214 {offsets = [0, 384], sizes = [8, 128], strides = [1, 1]} : vector<8x512xf32> to vector<8x128xf32>
    %230 = arith.negf %229 : vector<8x128xf32>
    %231 = math.exp %230 : vector<8x128xf32>
    %cst_50 = arith.constant 1.000000e+00 : f32
    %232 = vector.broadcast %cst_50 : f32 to vector<8x128xf32>
    %233 = arith.addf %232, %231 : vector<8x128xf32>
    %234 = arith.divf %232, %233 : vector<8x128xf32>
    %235 = arith.mulf %226, %208 : vector<8x128xf32>
    %236 = arith.mulf %220, %228 : vector<8x128xf32>
    %237 = arith.addf %235, %236 : vector<8x128xf32>
    %238 = math.tanh %237 : vector<8x128xf32>
    %239 = arith.mulf %234, %238 : vector<8x128xf32>
    %240 = vector.broadcast %c5_i32 : i32 to vector<8x1xi32>
    %241 = arith.cmpi slt, %240, %10 : vector<8x1xi32>
    %242 = vector.shape_cast %241 : vector<8x1xi1> to vector<8x1xi1>
    %243 = vector.broadcast %242 : vector<8x1xi1> to vector<8x128xi1>
    %244 = arith.select %243, %239, %205 : vector<8x128xi1>, vector<8x128xf32>
    %245 = vector.shape_cast %241 : vector<8x1xi1> to vector<8x1xi1>
    %246 = vector.broadcast %245 : vector<8x1xi1> to vector<8x128xi1>
    %247 = arith.select %246, %237, %208 : vector<8x128xi1>, vector<8x128xf32>
    %c6_i32 = arith.constant 6 : i32
    %248 = arith.index_cast %c6_i32 : i32 to index
    %c0_51 = arith.constant 0 : index
    %c0_52 = arith.constant 0 : index
    %249 = vector.load %arg9[%248, %c0_51, %c0_52] : memref<8x8x512xf32, #tpu.memory_space<vmem>>, vector<1x8x512xf32>
    %250 = vector.shape_cast %249 : vector<1x8x512xf32> to vector<8x512xf32>
    %251 = arith.truncf %244 : vector<8x128xf32> to vector<8x128xbf16>
    %cst_53 = arith.constant dense<0.000000e+00> : vector<8x512xf32>
    %252 = tpu.matmul %251, %11, %cst_53 {dimension_numbers = #tpu.dot_dimension_numbers<[1], [0], [0], [1], [0, 0, 1, 1], [], []>} : vector<8x128xbf16>, vector<128x512xbf16>, vector<8x512xf32> -> vector<8x512xf32>
    %253 = arith.addf %250, %252 : vector<8x512xf32>
    %254 = vector.extract_strided_slice %253 {offsets = [0, 0], sizes = [8, 128], strides = [1, 1]} : vector<8x512xf32> to vector<8x128xf32>
    %255 = arith.negf %254 : vector<8x128xf32>
    %256 = math.exp %255 : vector<8x128xf32>
    %cst_54 = arith.constant 1.000000e+00 : f32
    %257 = vector.broadcast %cst_54 : f32 to vector<8x128xf32>
    %258 = arith.addf %257, %256 : vector<8x128xf32>
    %259 = arith.divf %257, %258 : vector<8x128xf32>
    %260 = vector.extract_strided_slice %253 {offsets = [0, 128], sizes = [8, 128], strides = [1, 1]} : vector<8x512xf32> to vector<8x128xf32>
    %261 = arith.negf %260 : vector<8x128xf32>
    %262 = math.exp %261 : vector<8x128xf32>
    %cst_55 = arith.constant 1.000000e+00 : f32
    %263 = vector.broadcast %cst_55 : f32 to vector<8x128xf32>
    %264 = arith.addf %263, %262 : vector<8x128xf32>
    %265 = arith.divf %263, %264 : vector<8x128xf32>
    %266 = vector.extract_strided_slice %253 {offsets = [0, 256], sizes = [8, 128], strides = [1, 1]} : vector<8x512xf32> to vector<8x128xf32>
    %267 = math.tanh %266 : vector<8x128xf32>
    %268 = vector.extract_strided_slice %253 {offsets = [0, 384], sizes = [8, 128], strides = [1, 1]} : vector<8x512xf32> to vector<8x128xf32>
    %269 = arith.negf %268 : vector<8x128xf32>
    %270 = math.exp %269 : vector<8x128xf32>
    %cst_56 = arith.constant 1.000000e+00 : f32
    %271 = vector.broadcast %cst_56 : f32 to vector<8x128xf32>
    %272 = arith.addf %271, %270 : vector<8x128xf32>
    %273 = arith.divf %271, %272 : vector<8x128xf32>
    %274 = arith.mulf %265, %247 : vector<8x128xf32>
    %275 = arith.mulf %259, %267 : vector<8x128xf32>
    %276 = arith.addf %274, %275 : vector<8x128xf32>
    %277 = math.tanh %276 : vector<8x128xf32>
    %278 = arith.mulf %273, %277 : vector<8x128xf32>
    %279 = vector.broadcast %c6_i32 : i32 to vector<8x1xi32>
    %280 = arith.cmpi slt, %279, %10 : vector<8x1xi32>
    %281 = vector.shape_cast %280 : vector<8x1xi1> to vector<8x1xi1>
    %282 = vector.broadcast %281 : vector<8x1xi1> to vector<8x128xi1>
    %283 = arith.select %282, %278, %244 : vector<8x128xi1>, vector<8x128xf32>
    %284 = vector.shape_cast %280 : vector<8x1xi1> to vector<8x1xi1>
    %285 = vector.broadcast %284 : vector<8x1xi1> to vector<8x128xi1>
    %286 = arith.select %285, %276, %247 : vector<8x128xi1>, vector<8x128xf32>
    %c7_i32 = arith.constant 7 : i32
    %287 = arith.index_cast %c7_i32 : i32 to index
    %c0_57 = arith.constant 0 : index
    %c0_58 = arith.constant 0 : index
    %288 = vector.load %arg9[%287, %c0_57, %c0_58] : memref<8x8x512xf32, #tpu.memory_space<vmem>>, vector<1x8x512xf32>
    %289 = vector.shape_cast %288 : vector<1x8x512xf32> to vector<8x512xf32>
    %290 = arith.truncf %283 : vector<8x128xf32> to vector<8x128xbf16>
    %cst_59 = arith.constant dense<0.000000e+00> : vector<8x512xf32>
    %291 = tpu.matmul %290, %11, %cst_59 {dimension_numbers = #tpu.dot_dimension_numbers<[1], [0], [0], [1], [0, 0, 1, 1], [], []>} : vector<8x128xbf16>, vector<128x512xbf16>, vector<8x512xf32> -> vector<8x512xf32>
    %292 = arith.addf %289, %291 : vector<8x512xf32>
    %293 = vector.extract_strided_slice %292 {offsets = [0, 0], sizes = [8, 128], strides = [1, 1]} : vector<8x512xf32> to vector<8x128xf32>
    %294 = arith.negf %293 : vector<8x128xf32>
    %295 = math.exp %294 : vector<8x128xf32>
    %cst_60 = arith.constant 1.000000e+00 : f32
    %296 = vector.broadcast %cst_60 : f32 to vector<8x128xf32>
    %297 = arith.addf %296, %295 : vector<8x128xf32>
    %298 = arith.divf %296, %297 : vector<8x128xf32>
    %299 = vector.extract_strided_slice %292 {offsets = [0, 128], sizes = [8, 128], strides = [1, 1]} : vector<8x512xf32> to vector<8x128xf32>
    %300 = arith.negf %299 : vector<8x128xf32>
    %301 = math.exp %300 : vector<8x128xf32>
    %cst_61 = arith.constant 1.000000e+00 : f32
    %302 = vector.broadcast %cst_61 : f32 to vector<8x128xf32>
    %303 = arith.addf %302, %301 : vector<8x128xf32>
    %304 = arith.divf %302, %303 : vector<8x128xf32>
    %305 = vector.extract_strided_slice %292 {offsets = [0, 256], sizes = [8, 128], strides = [1, 1]} : vector<8x512xf32> to vector<8x128xf32>
    %306 = math.tanh %305 : vector<8x128xf32>
    %307 = vector.extract_strided_slice %292 {offsets = [0, 384], sizes = [8, 128], strides = [1, 1]} : vector<8x512xf32> to vector<8x128xf32>
    %308 = arith.negf %307 : vector<8x128xf32>
    %309 = math.exp %308 : vector<8x128xf32>
    %cst_62 = arith.constant 1.000000e+00 : f32
    %310 = vector.broadcast %cst_62 : f32 to vector<8x128xf32>
    %311 = arith.addf %310, %309 : vector<8x128xf32>
    %312 = arith.divf %310, %311 : vector<8x128xf32>
    %313 = arith.mulf %304, %286 : vector<8x128xf32>
    %314 = arith.mulf %298, %306 : vector<8x128xf32>
    %315 = arith.addf %313, %314 : vector<8x128xf32>
    %316 = math.tanh %315 : vector<8x128xf32>
    %317 = arith.mulf %312, %316 : vector<8x128xf32>
    %318 = vector.broadcast %c7_i32 : i32 to vector<8x1xi32>
    %319 = arith.cmpi slt, %318, %10 : vector<8x1xi32>
    %320 = vector.shape_cast %319 : vector<8x1xi1> to vector<8x1xi1>
    %321 = vector.broadcast %320 : vector<8x1xi1> to vector<8x128xi1>
    %322 = arith.select %321, %317, %283 : vector<8x128xi1>, vector<8x128xf32>
    %323 = vector.shape_cast %319 : vector<8x1xi1> to vector<8x1xi1>
    %324 = vector.broadcast %323 : vector<8x1xi1> to vector<8x128xi1>
    %325 = arith.select %324, %315, %286 : vector<8x128xi1>, vector<8x128xf32>
    %c8_i32 = arith.constant 8 : i32
    %326 = arith.truncf %322 : vector<8x128xf32> to vector<8x128xbf16>
    %c0_63 = arith.constant 0 : index
    %c0_64 = arith.constant 0 : index
    %327 = vector.load %arg6[%c0_63, %c0_64] : memref<128x768xbf16, #tpu.memory_space<vmem>>, vector<128x768xbf16>
    %cst_65 = arith.constant dense<0.000000e+00> : vector<8x768xf32>
    %328 = tpu.matmul %326, %327, %cst_65 {dimension_numbers = #tpu.dot_dimension_numbers<[1], [0], [0], [1], [0, 0, 1, 1], [], []>} : vector<8x128xbf16>, vector<128x768xbf16>, vector<8x768xf32> -> vector<8x768xf32>
    %c0_66 = arith.constant 0 : index
    %c0_67 = arith.constant 0 : index
    %329 = vector.load %arg7[%c0_66, %c0_67] : memref<1x768xf32, #tpu.memory_space<vmem>>, vector<1x768xf32>
    %330 = vector.broadcast %329 : vector<1x768xf32> to vector<8x768xf32>
    %331 = arith.addf %328, %330 : vector<8x768xf32>
    %c0_68 = arith.constant 0 : index
    %c0_69 = arith.constant 0 : index
    %332 = vector.load %arg8[%c0_68, %c0_69] : memref<8x768xf32, #tpu.memory_space<vmem>>, vector<8x768xf32>
    tpu.vector_store %arg8[%c0_68, %c0_69], %331 {strides = array<i32>} : memref<8x768xf32, #tpu.memory_space<vmem>>, vector<8x768xf32>,
    return
  }
  func.func @transform_0(%arg0: i32) -> (i32, i32, i32) {
    %c0_i32 = arith.constant 0 : i32
    %c0_i32_0 = arith.constant 0 : i32
    %c0_i32_1 = arith.constant 0 : i32
    return %c0_i32, %arg0, %c0_i32_0 : i32, i32, i32
  }
  func.func @transform_1(%arg0: i32) -> (i32, i32) {
    %c0_i32 = arith.constant 0 : i32
    %c0_i32_0 = arith.constant 0 : i32
    return %arg0, %c0_i32 : i32, i32
  }
  func.func @transform_2(%arg0: i32) -> (i32, i32) {
    %c0_i32 = arith.constant 0 : i32
    %c0_i32_0 = arith.constant 0 : i32
    %c0_i32_1 = arith.constant 0 : i32
    return %c0_i32, %c0_i32_0 : i32, i32
  }
  func.func @transform_3(%arg0: i32) -> (i32, i32) {
    %c0_i32 = arith.constant 0 : i32
    %c0_i32_0 = arith.constant 0 : i32
    %c0_i32_1 = arith.constant 0 : i32
    return %c0_i32, %c0_i32_0 : i32, i32
  }
  func.func @transform_4(%arg0: i32) -> (i32, i32) {
    %c0_i32 = arith.constant 0 : i32
    %c0_i32_0 = arith.constant 0 : i32
    %c0_i32_1 = arith.constant 0 : i32
    return %c0_i32, %c0_i32_0 : i32, i32
  }
  func.func @transform_5(%arg0: i32) -> (i32, i32) {
    %c0_i32 = arith.constant 0 : i32
    %c0_i32_0 = arith.constant 0 : i32
    %c0_i32_1 = arith.constant 0 : i32
    return %c0_i32, %c0_i32_0 : i32, i32
  }
  func.func @transform_6(%arg0: i32) -> (i32, i32) {
    %c0_i32 = arith.constant 0 : i32
    %c0_i32_0 = arith.constant 0 : i32
    %c0_i32_1 = arith.constant 0 : i32
    return %c0_i32, %c0_i32_0 : i32, i32
  }
  func.func @transform_7(%arg0: i32) -> (i32, i32) {
    %c0_i32 = arith.constant 0 : i32
    %c0_i32_0 = arith.constant 0 : i32
    return %arg0, %c0_i32 : i32, i32
  }
}

</mosaic_0001>

<bundles_post_ra>
// kernel: tpu_custom_call.1
= control target key start
LH: loop header
LB: loop body
LE: loop exit
PB: predicated region body
PF: predicated region fallthrough
CT: control target
= control target key end

     0   :  { %12 = vsyncpa [#allocation4], 0  ;;  %s3386_s0 = inlined_call_operand.hbm [shape: f32[8,8,16], index: 0, kind: input, shape index: {}]   ;;  %s3387_s1 = inlined_call_operand.vmem [shape: s32[8,1], index: 1, kind: input, shape index: {}]   ;;  %s3388_s2 = inlined_call_operand.hbm [shape: bf16[16,512], index: 2, kind: input, shape index: {}]   ;;  %s3389_s3 = inlined_call_operand.hbm [shape: bf16[128,512], index: 3, kind: input, shape index: {}]   ;;  %s3390_s4 = inlined_call_operand.vmem [shape: f32[1,512], index: 4, kind: input, shape index: {}]   ;;  %s3391_s5 = inlined_call_operand.hbm [shape: bf16[128,768], index: 5, kind: input, shape index: {}]   ;;  %s3392_s6 = inlined_call_operand.vmem [shape: f32[1,768], index: 6, kind: input, shape index: {}]   ;;  %s3393_s7 = inlined_call_operand.hbm [shape: f32[8,768], index: 7, kind: output, shape index: {}]  }
   0x1   :  { %13 = vsyncpa [#allocation7], 0 }
   0x2   :  { %14 = vsyncpa [#allocation10], 0  ;;  %s35_s26 = sshll.u32 %s3388_s2, 4  ;;  %s36_s26 = int_to_ptr.hbm [resolvable:$true] %s35_s26 }
   0x3   :  { %15 = vsyncpa [#allocation5], 0  ;;  %s2704_s27 = smov [#allocation6]   ;;  %s20_s8 = sshll.u32 %s3386_s0, 4  ;;  %s21_s8 = int_to_ptr.hbm [resolvable:$true] %s20_s8 }
   0x4   :  { %s37_s28 = sshll.u32 %s2704_s27, 4  ;;  %s2705_s9 = smov 256   ;;  %s38_s28 = int_to_ptr.vmem [resolvable:$true] %s37_s28 }
   0x5   :  { %s2706_s10 = smov 16   ;;  %s2707_s11 = smov [#allocation3]  }
   0x6   :  { %43 = dma.hbm_to_vmem [thread:$0]  %s36_s26, 512, %s38_s28, [#allocation7], %s2705_s9, %s2705_s9, %s2706_s10  }
   0x7   :  { %s22_s12 = sshll.u32 %s2707_s11, 4  ;;  %s2708_s13 = smov 128   ;;  %s23_s12 = int_to_ptr.vmem [resolvable:$true] %s22_s12 }
   0x8   :  { %s2709_s14 = smov 8   ;;  %s48_s16 = sshll.u32 %s3389_s3, 4  ;;  %s49_s16 = int_to_ptr.hbm [resolvable:$true] %s48_s16 }
   0x9   :  { %28 = dma.hbm_to_vmem [thread:$0]  %s21_s8, 1024, %s23_s12, [#allocation4], %s2708_s13, %s2708_s13, %s2709_s14  }
   0xa   :  { %s2710_s17 = smov [#allocation8]   ;;  %s63_s20 = sshll.u32 %s3391_s5, 4  ;;  %s64_s20 = int_to_ptr.hbm [resolvable:$true] %s63_s20 }
   0xb   :  { %s50_s18 = sshll.u32 %s2710_s17, 4  ;;  %s2711_s21 = smov [#allocation9]   ;;  %s51_s18 = int_to_ptr.vmem [resolvable:$true] %s50_s18 }
   0xc   :  { %56 = dma.hbm_to_vmem [thread:$0]  %s49_s16, 4096, %s51_s18, [#allocation7], %s2705_s9, %s2705_s9, %s2706_s10  }
   0xd   :  { %s65_s22 = sshll.u32 %s2711_s21, 4  ;;  %s2712_s23 = smov 384   ;;  %s66_s22 = int_to_ptr.vmem [resolvable:$true] %s65_s22 }
   0xe   :  { %s2713_s24 = smov 24  }
   0xf   :  { %71 = dma.hbm_to_vmem [thread:$0]  %s64_s20, 6144, %s66_s22, [#allocation10], %s2712_s23, %s2712_s23, %s2713_s24  }
  0x10   :  { %2696 = dma.done.wait [#allocation4], 1024  }
  0x11   :  { %2697 = vsyncadd [#allocation4], 4294966272 }
  0x12   :  { %2698 = dma.done.wait [#allocation7], 4608  }
  0x13   :  { %2699 = vsyncadd [#allocation7], 4294962688 }
  0x14   :  { %2700 = dma.done.wait [#allocation10], 6144  }
  0x15   :  { %2701 = vsyncadd [#allocation10], 4294961152  ;;  %v1960_v0 = vld [vmem:[#allocation6] sm:$0xf]  ;;  %v2348_v1 = vld [vmem:[#allocation6 + $0xc] sm:$0xf0] }
  0x16   :  { %v2346_v2 = vld [vmem:[#allocation6 + $0x4] sm:$0xf]  ;;  %v1961_v3 = vor.u32 %v2348_v1, %v1960_v0  ;;  %v1962_v4 = vld [vmem:[#allocation6 + $0x10] sm:$0xf0]  ;;  %v92_v6 = vld [vmem:[#allocation3 + $0x8] sm:$0xff]  ;;  %vm137_vm0 = vcmask 130048  }
  0x17   :  { %v91_v5 = vld [vmem:[#allocation3] sm:$0xff]  ;;  %v1965_v7 = vor.u32 %v2346_v2, %v1962_v4  ;;  %v97_v9 = vld [vmem:[#allocation3 + $0x30] sm:$0xff]  ;;  %v98_v10 = vld [vmem:[#allocation3 + $0x38] sm:$0xff]  ;;  %s1946_s9 = sshll.u32 %s3393_s7, 4  ;;  %s1947_s9 = int_to_ptr.hbm [resolvable:$true] %s1946_s9 }
  0x18   :  { %v2768_v8 = vpack.c.bf16 %v92_v6, %v91_v5  ;;  %v2347_v11 = vld [vmem:[#allocation6 + $0xc] sm:$0xf]  ;;  %157 = vmatpush.bf16.msra.mxu0 %v1961_v3  ;;  %2430 = vmatpush.bf16.msra.mxu2 %v1961_v3  ;;  %v2770_v12 = vpack.c.bf16 %v98_v10, %v97_v9  ;;  %v1970_v13 = vld [vmem:[#allocation6 + $0x18] sm:$0xf0]  ;;  %v1968_v14 = vld [vmem:[#allocation6 + $0x8] sm:$0xf] }
  0x19   :  { %v2349_v15 = vld [vmem:[#allocation6 + $0x14] sm:$0xf0]  ;;  %186 = vmatpush.bf16.msra.mxu1 %v1965_v7  ;;  %2431 = vmatpush.bf16.msra.mxu3 %v1965_v7  ;;  %v1973_v16 = vor.u32 %v2347_v11, %v1970_v13  ;;  %v2379_v18 = vld [vmem:[#allocation8 + $0xec] sm:$0xf]  ;;  %v2114_v19 = vld [vmem:[#allocation8 + $0xf8] sm:$0xf0] }
  0x1a   :  { %v1969_v17 = vor.u32 %v2349_v15, %v1968_v14  ;;  %v2104_v20 = vld [vmem:[#allocation8 + $0xe0] sm:$0xf]  ;;  %v2380_v21 = vld [vmem:[#allocation8 + $0xec] sm:$0xf0]  ;;  %v2776_v22 = vor.u32 %v2379_v18, %v2114_v19  ;;  %v2378_v24 = vld [vmem:[#allocation8 + $0xe4] sm:$0xf] }
  0x1b   :  { %1974 = vmatmul.msk.bf16.vlgmr.msra.gmra.mxu0 %vm137_vm0, %v2768_v8  ;;  %1977 = vmatmul.msk.bf16.vlgmr.msra.gmra.mxu2 %vm137_vm0, %v2770_v12  ;;  %v2778_v23 = vor.u32 %v2380_v21, %v2104_v20  ;;  %v2106_v25 = vld [vmem:[#allocation8 + $0xf0] sm:$0xf0]  ;;  %v2088_v26 = vld [vmem:[#allocation8 + $0xc0] sm:$0xf]  ;;  %v2376_v28 = vld [vmem:[#allocation8 + $0xcc] sm:$0xf0] }
  0x1c   :  { %1978 = vmatmul.msk.bf16.vlgmr.msra.gmra.mxu1 %vm137_vm0, %v2768_v8  ;;  %1981 = vmatmul.msk.bf16.vlgmr.msra.gmra.mxu3 %vm137_vm0, %v2770_v12  ;;  %v2784_v27 = vor.u32 %v2378_v24, %v2106_v25  ;;  %v2374_v29 = vld [vmem:[#allocation8 + $0xc4] sm:$0xf]  ;;  %v2090_v30 = vld [vmem:[#allocation8 + $0xd0] sm:$0xf0]  ;;  %v2375_v31 = vld [vmem:[#allocation8 + $0xcc] sm:$0xf]  ;;  %v2788_v33 = vor.u32 %v2376_v28, %v2088_v26 }
  0x1d   :  { %244 = vmatpush.bf16.msrb.mxu3 %v1973_v16  ;;  %215 = vmatpush.bf16.msrb.mxu2 %v1969_v17  ;;  %v2098_v32 = vld [vmem:[#allocation8 + $0xd8] sm:$0xf0]  ;;  %v2072_v35 = vld [vmem:[#allocation8 + $0xa0] sm:$0xf]  ;;  %v2793_v36 = vor.u32 %v2374_v29, %v2090_v30  ;;  %v2372_v37 = vld [vmem:[#allocation8 + $0xac] sm:$0xf0] }
  0x1e   :  { %495 = vmatpush.bf16.msrb.mxu0 %v2778_v23  ;;  %v2790_v34 = vor.u32 %v2375_v31, %v2098_v32  ;;  %508 = vmatpush.bf16.msrb.mxu1 %v2784_v27  ;;  %v2112_v38 = vld [vmem:[#allocation8 + $0xe8] sm:$0xf]  ;;  %v2381_v39 = vld [vmem:[#allocation8 + $0xf4] sm:$0xf0]  ;;  %v2370_v40 = vld [vmem:[#allocation8 + $0xa4] sm:$0xf]  ;;  %v2799_v44 = vor.u32 %v2372_v37, %v2072_v35 }
  0x1f   :  { %v2074_v41 = vld [vmem:[#allocation8 + $0xb0] sm:$0xf0]  ;;  %v2795_v42 = vor.u32 %v2381_v39, %v2112_v38  ;;  %v2371_v43 = vld [vmem:[#allocation8 + $0xac] sm:$0xf]  ;;  %v2082_v45 = vld [vmem:[#allocation8 + $0xb8] sm:$0xf0] }
  0x20   :  { %v2802_v46 = vor.u32 %v2370_v40, %v2074_v41  ;;  %v2056_v47 = vld [vmem:[#allocation8 + $0x80] sm:$0xf]  ;;  %v2368_v48 = vld [vmem:[#allocation8 + $0x8c] sm:$0xf0]  ;;  %v2805_v49 = vor.u32 %v2371_v43, %v2082_v45  ;;  %v2096_v50 = vld [vmem:[#allocation8 + $0xc8] sm:$0xf] }
  0x21   :  { %534 = vmatpush.bf16.msra.mxu3 %v2776_v22  ;;  %521 = vmatpush.bf16.msra.mxu2 %v2795_v42  ;;  %v93_v51 = vld [vmem:[#allocation3 + $0x10] sm:$0xff]  ;;  %v94_v52 = vld [vmem:[#allocation3 + $0x18] sm:$0xff]  ;;  %v2367_v55 = vld [vmem:[#allocation8 + $0x8c] sm:$0xf]  ;;  %v2810_v56 = vor.u32 %v2368_v48, %v2056_v47  ;;  %v3394_v26 = vmov 0  }
  0x22   :  { %496 = vmatpush.bf16.msrb.mxu0 %v2788_v33  ;;  %509 = vmatpush.bf16.msrb.mxu1 %v2793_v36  ;;  %v2377_v53 = vld [vmem:[#allocation8 + $0xd4] sm:$0xf0]  ;;  %v2366_v57 = vld [vmem:[#allocation8 + $0x84] sm:$0xf]  ;;  %v2058_v58 = vld [vmem:[#allocation8 + $0x90] sm:$0xf0]  ;;  %v2813_v60 = vpack.c.bf16 %v94_v52, %v93_v51 }
  0x23   :  { %v2807_v54 = vor.u32 %v2377_v53, %v2096_v50  ;;  %v2066_v59 = vld [vmem:[#allocation8 + $0x98] sm:$0xf0]  ;;  %v2040_v61 = vld [vmem:[#allocation8 + $0x60] sm:$0xf]  ;;  %v2364_v62 = vld [vmem:[#allocation8 + $0x6c] sm:$0xf0]  ;;  %v2819_v2 = vor.u32 %v2366_v57, %v2058_v58  ;;  %2444 = vset.pattern.permute.xlu0 %v3394_v26  ;;  %2445 = vset.pattern.permute.xlu1 %v3394_v26 }
  0x24   :  { %v2817_v63 = vor.u32 %v2367_v55, %v2066_v59  ;;  %v2080_v0 = vld [vmem:[#allocation8 + $0xa8] sm:$0xf]  ;;  %v2373_v1 = vld [vmem:[#allocation8 + $0xb4] sm:$0xf0]  ;;  %v2824_v4 = vor.u32 %v2364_v62, %v2040_v61  ;;  %v2362_v5 = vld [vmem:[#allocation8 + $0x64] sm:$0xf]  ;;  %2446 = vset.pattern.permute.xlu2 %v3394_v26 }
  0x25   :  { %535 = vmatpush.bf16.msra.mxu3 %v2790_v34  ;;  %522 = vmatpush.bf16.msra.mxu2 %v2807_v54  ;;  %v2821_v3 = vor.u32 %v2373_v1, %v2080_v0  ;;  %v2042_v6 = vld [vmem:[#allocation8 + $0x70] sm:$0xf0]  ;;  %v2024_v7 = vld [vmem:[#allocation8 + $0x40] sm:$0xf]  ;;  %v2360_v9 = vld [vmem:[#allocation8 + $0x4c] sm:$0xf0] }
  0x26   :  { %497 = vmatpush.bf16.msrb.mxu0 %v2799_v44  ;;  %510 = vmatpush.bf16.msrb.mxu1 %v2802_v46  ;;  %v2358_v10 = vld [vmem:[#allocation8 + $0x44] sm:$0xf]  ;;  %v2363_v11 = vld [vmem:[#allocation8 + $0x6c] sm:$0xf]  ;;  %v2050_v13 = vld [vmem:[#allocation8 + $0x78] sm:$0xf0]  ;;  %v2836_v15 = vor.u32 %v2362_v5, %v2042_v6  ;;  %v2842_v20 = vor.u32 %v2360_v9, %v2024_v7 }
  0x27   :  { %v2064_v14 = vld [vmem:[#allocation8 + $0x88] sm:$0xf]  ;;  %v2839_v16 = vor.u32 %v2363_v11, %v2050_v13  ;;  %v2369_v17 = vld [vmem:[#allocation8 + $0x94] sm:$0xf0]  ;;  %v2359_v18 = vld [vmem:[#allocation8 + $0x4c] sm:$0xf] }
  0x28   :  { %v2034_v19 = vld [vmem:[#allocation8 + $0x58] sm:$0xf0]  ;;  %v2844_v21 = vor.u32 %v2369_v17, %v2064_v14  ;;  %v2048_v24 = vld [vmem:[#allocation8 + $0x68] sm:$0xf]  ;;  %v2365_v25 = vld [vmem:[#allocation8 + $0x74] sm:$0xf0] }
  0x29   :  { %536 = vmatpush.bf16.msra.mxu3 %v2805_v49  ;;  %523 = vmatpush.bf16.msra.mxu2 %v2821_v3  ;;  %v2008_v28 = vld [vmem:[#allocation8 + $0x20] sm:$0xf]  ;;  %v2356_v29 = vld [vmem:[#allocation8 + $0x2c] sm:$0xf0]  ;;  %v2848_v30 = vor.u32 %v2359_v18, %v2034_v19  ;;  %v2856_v32 = vor.u32 %v2365_v25, %v2048_v24  ;;  %v2354_v37 = vld [vmem:[#allocation8 + $0x24] sm:$0xf] }
  0x2a   :  { %498 = vmatpush.bf16.msrb.mxu0 %v2810_v56  ;;  %511 = vmatpush.bf16.msrb.mxu1 %v2819_v2  ;;  %v2859_v35 = vor.u32 %v2356_v29, %v2008_v28  ;;  %v2010_v38 = vld [vmem:[#allocation8 + $0x30] sm:$0xf0]  ;;  %v1992_v39 = vld [vmem:[#allocation8] sm:$0xf]  ;;  %v2352_v40 = vld [vmem:[#allocation8 + $0xc] sm:$0xf0] }
  0x2b   :  { %1975 = vmatmul.msk.bf16.gmra.mxu0 %vm137_vm0, %v2813_v60  ;;  %1982 = vmatmul.msk.bf16.vlgmr.msrb.gmra.mxu2 %vm137_vm0, %v2768_v8  ;;  %v95_v41 = vld [vmem:[#allocation3 + $0x20] sm:$0xff]  ;;  %v96_v43 = vld [vmem:[#allocation3 + $0x28] sm:$0xff]  ;;  %v2863_v45 = vor.u32 %v2354_v37, %v2010_v38  ;;  %v2867_v47 = vor.u32 %v2352_v40, %v1992_v39  ;;  %v1994_v50 = vld [vmem:[#allocation8 + $0x10] sm:$0xf0] }
  0x2c   :  { %1979 = vmatmul.msk.bf16.gmra.mxu1 %vm137_vm0, %v2813_v60  ;;  %1986 = vmatmul.msk.bf16.vlgmr.msrb.gmra.mxu3 %vm137_vm0, %v2768_v8  ;;  %v2026_v8 = vld [vmem:[#allocation8 + $0x50] sm:$0xf0]  ;;  %v2350_v48 = vld [vmem:[#allocation8 + $0x4] sm:$0xf]  ;;  %v101_v51 = vpack.c.bf16 %v96_v43, %v95_v41  ;;  %v2355_v53 = vld [vmem:[#allocation8 + $0x2c] sm:$0xf] }
  0x2d   :  { %537 = vmatpush.bf16.msra.mxu3 %v2817_v63  ;;  %v2853_v31 = vor.u32 %v2358_v10, %v2026_v8  ;;  %524 = vmatpush.bf16.msra.mxu2 %v2844_v21  ;;  %v2870_v52 = vor.u32 %v2350_v48, %v1994_v50  ;;  %v2018_v55 = vld [vmem:[#allocation8 + $0x38] sm:$0xf0]  ;;  %v2032_v57 = vld [vmem:[#allocation8 + $0x48] sm:$0xf]  ;;  %v2361_v59 = vld [vmem:[#allocation8 + $0x54] sm:$0xf0] }
  0x2e   :  { %499 = vmatpush.bf16.msrb.mxu0 %v2824_v4  ;;  %512 = vmatpush.bf16.msrb.mxu1 %v2836_v15  ;;  %v2880_v58 = vor.u32 %v2355_v53, %v2018_v55  ;;  %v2351_v61 = vld [vmem:[#allocation8 + $0xc] sm:$0xf]  ;;  %v2002_v62 = vld [vmem:[#allocation8 + $0x18] sm:$0xf0]  ;;  %v2883_v0 = vor.u32 %v2361_v59, %v2032_v57  ;;  %v2016_v1 = vld [vmem:[#allocation8 + $0x28] sm:$0xf] }
  0x2f   :  { %v2357_v5 = vld [vmem:[#allocation8 + $0x34] sm:$0xf0]  ;;  %v2000_v7 = vld [vmem:[#allocation8 + $0x8] sm:$0xf]  ;;  %v2913_v11 = vld [vmem:[%s3387_s1] sm:$0xff] }
  0x30   :  { %v2890_v6 = vor.u32 %v2357_v5, %v2016_v1  ;;  %v2353_v9 = vld [vmem:[#allocation8 + $0x14] sm:$0xf0]  ;;  %vm614_vm1 = vcmp.gt.s32.totalorder %v2913_v11, 0  ;;  %vm747_vm2 = vcmp.gt.s32.totalorder %v2913_v11, 1  ;;  %vm1412_vm3 = vcmp.gt.s32.totalorder %v2913_v11, 6 }
  0x31   :  { %538 = vmatpush.bf16.msra.mxu3 %v2839_v16  ;;  %525 = vmatpush.bf16.msra.mxu2 %v2856_v32  ;;  %v2896_v10 = vor.u32 %v2353_v9, %v2000_v7  ;;  %v615_v13 = vsel %vm614_vm1, 1, %v3394_v26  ;;  %v748_v14 = vsel %vm747_vm2, 1, %v3394_v26  ;;  %v107_v18 = vld [vmem:[%s3390_s4] sm:$0xf]  ;;  %vm880_vm2 = vcmp.gt.s32.totalorder %v2913_v11, 2 }
  0x32   :  { %500 = vmatpush.bf16.msrb.mxu0 %v2842_v20  ;;  %513 = vmatpush.bf16.msrb.mxu1 %v2853_v31  ;;  %v2983_v8 = vperm.slane %v107_v18, 0  ;;  %v2985_v24 = vperm.slane %v107_v18, 1 }
  0x33   :  { %617 = vperm.xlu0 %2444, %v615_v13  }
  0x35   :  { %539 = vmatpush.bf16.msra.mxu3 %v2848_v30  ;;  %526 = vmatpush.bf16.msra.mxu2 %v2883_v0 }
  0x36   :  { %501 = vmatpush.bf16.msrb.mxu0 %v2859_v35  ;;  %514 = vmatpush.bf16.msrb.mxu1 %v2863_v45 }
  0x39   :  { %540 = vmatpush.bf16.msra.mxu3 %v2880_v58  ;;  %527 = vmatpush.bf16.msra.mxu2 %v2890_v6 }
  0x3a   :  { %502 = vmatpush.bf16.msrb.mxu0 %v2867_v47  ;;  %515 = vmatpush.bf16.msrb.mxu1 %v2870_v52 }
  0x3b   :  { %1976 = vmatmul.msk.bf16.gmra.mxu0 %vm137_vm0, %v101_v51  ;;  %1983 = vmatmul.msk.bf16.gmra.mxu2 %vm137_vm0, %v2813_v60 }
  0x3c   :  { %1980 = vmatmul.msk.bf16.gmra.mxu1 %vm137_vm0, %v101_v51  ;;  %1987 = vmatmul.msk.bf16.gmra.mxu3 %vm137_vm0, %v2813_v60  ;;  %v2887_v60 = vor.u32 %v2351_v61, %v2002_v62 }
  0x3d   :  { %528 = vmatpush.bf16.msra.mxu2 %v2896_v10  ;;  %750 = vperm.xlu0 %2444, %v748_v14  }
  0x3e   :  { %628 = vmatpush.bf16.msra.mxu0 %v2778_v23  ;;  %641 = vmatpush.bf16.msra.mxu1 %v2784_v27 }
  0x3f   :  { %541 = vmatpush.bf16.msra.mxu3 %v2887_v60 }
  0x41   :  { %654 = vmatpush.bf16.msrb.mxu2 %v2795_v42 }
  0x42   :  { %629 = vmatpush.bf16.msra.mxu0 %v2788_v33  ;;  %642 = vmatpush.bf16.msra.mxu1 %v2793_v36 }
  0x43   :  { %667 = vmatpush.bf16.msrb.mxu3 %v2776_v22 }
  0x45   :  { %655 = vmatpush.bf16.msrb.mxu2 %v2807_v54 }
  0x46   :  { %630 = vmatpush.bf16.msra.mxu0 %v2799_v44  ;;  %643 = vmatpush.bf16.msra.mxu1 %v2802_v46 }
  0x47   :  { %668 = vmatpush.bf16.msrb.mxu3 %v2790_v34 }
  0x49   :  { %656 = vmatpush.bf16.msrb.mxu2 %v2821_v3 }
  0x4a   :  { %631 = vmatpush.bf16.msra.mxu0 %v2810_v56  ;;  %644 = vmatpush.bf16.msra.mxu1 %v2819_v2 }
  0x4b   :  { %1984 = vmatmul.msk.bf16.gmra.mxu2 %vm137_vm0, %v101_v51  ;;  %503 = vmatmul.bf16.vlgmr.msrb.gmra.mxu0 %v3394_v26 }
  0x4c   :  { %1988 = vmatmul.msk.bf16.gmra.mxu3 %vm137_vm0, %v101_v51  ;;  %516 = vmatmul.bf16.vlgmr.msrb.gmra.mxu1 %v3394_v26 }
  0x4d   :  { %669 = vmatpush.bf16.msrb.mxu3 %v2805_v49  ;;  %657 = vmatpush.bf16.msrb.mxu2 %v2844_v21 }
  0x4e   :  { %632 = vmatpush.bf16.msra.mxu0 %v2824_v4  ;;  %645 = vmatpush.bf16.msra.mxu1 %v2836_v15 }
  0x51   :  { %670 = vmatpush.bf16.msrb.mxu3 %v2817_v63  ;;  %658 = vmatpush.bf16.msrb.mxu2 %v2856_v32 }
  0x52   :  { %633 = vmatpush.bf16.msra.mxu0 %v2842_v20  ;;  %646 = vmatpush.bf16.msra.mxu1 %v2853_v31 }
  0x55   :  { %671 = vmatpush.bf16.msrb.mxu3 %v2839_v16  ;;  %659 = vmatpush.bf16.msrb.mxu2 %v2883_v0 }
  0x56   :  { %634 = vmatpush.bf16.msra.mxu0 %v2859_v35  ;;  %647 = vmatpush.bf16.msra.mxu1 %v2863_v45 }
  0x59   :  { %672 = vmatpush.bf16.msrb.mxu3 %v2848_v30  ;;  %660 = vmatpush.bf16.msrb.mxu2 %v2890_v6 }
  0x5a   :  { %635 = vmatpush.bf16.msra.mxu0 %v2867_v47  ;;  %648 = vmatpush.bf16.msra.mxu1 %v2870_v52 }
  0x5b   :  { %1985 = vmatmul.msk.bf16.gmra.mxu2 %vm137_vm0, %v2770_v12 }
  0x5c   :  { %1989 = vmatmul.msk.bf16.gmra.mxu3 %vm137_vm0, %v2770_v12  ;;  %v1413_v12 = vsel %vm1412_vm3, 1, %v3394_v26  ;;  %vm1013_vm3 = vcmp.gt.s32.totalorder %v2913_v11, 3 }
  0x5d   :  { %673 = vmatpush.bf16.msrb.mxu3 %v2880_v58  ;;  %661 = vmatpush.bf16.msrb.mxu2 %v2896_v10 }
  0x5e   :  { %761 = vmatpush.bf16.msrb.mxu0 %v2778_v23  ;;  %774 = vmatpush.bf16.msrb.mxu1 %v2784_v27 }
  0x5f   :  { %1415 = vperm.xlu0 %2444, %v1413_v12   ;;  %v3027_v12 = vperm.slane %v107_v18, 2 }
  0x61   :  { %674 = vmatpush.bf16.msrb.mxu3 %v2887_v60 }
  0x62   :  { %762 = vmatpush.bf16.msrb.mxu0 %v2788_v33  ;;  %775 = vmatpush.bf16.msrb.mxu1 %v2793_v36 }
  0x66   :  { %763 = vmatpush.bf16.msrb.mxu0 %v2799_v44  ;;  %776 = vmatpush.bf16.msrb.mxu1 %v2802_v46 }
  0x6a   :  { %764 = vmatpush.bf16.msrb.mxu0 %v2810_v56  ;;  %777 = vmatpush.bf16.msrb.mxu1 %v2819_v2 }
  0x6b   :  { %529 = vmatmul.bf16.vlgmr.msra.gmra.mxu2 %v3394_v26 }
  0x6c   :  { %542 = vmatmul.bf16.vlgmr.msra.gmra.mxu3 %v3394_v26  ;;  %787 = vmatpush.bf16.msra.mxu2 %v2795_v42 }
  0x6d   :  { %800 = vmatpush.bf16.msra.mxu3 %v2776_v22 }
  0x6e   :  { %765 = vmatpush.bf16.msrb.mxu0 %v2824_v4  ;;  %778 = vmatpush.bf16.msrb.mxu1 %v2836_v15 }
  0x70   :  { %788 = vmatpush.bf16.msra.mxu2 %v2807_v54 }
  0x71   :  { %801 = vmatpush.bf16.msra.mxu3 %v2790_v34 }
  0x72   :  { %766 = vmatpush.bf16.msrb.mxu0 %v2842_v20  ;;  %779 = vmatpush.bf16.msrb.mxu1 %v2853_v31 }
  0x74   :  { %789 = vmatpush.bf16.msra.mxu2 %v2821_v3 }
  0x75   :  { %802 = vmatpush.bf16.msra.mxu3 %v2805_v49 }
  0x76   :  { %767 = vmatpush.bf16.msrb.mxu0 %v2859_v35  ;;  %780 = vmatpush.bf16.msrb.mxu1 %v2863_v45 }
  0x78   :  { %790 = vmatpush.bf16.msra.mxu2 %v2844_v21 }
  0x79   :  { %803 = vmatpush.bf16.msra.mxu3 %v2817_v63 }
  0x7a   :  { %768 = vmatpush.bf16.msrb.mxu0 %v2867_v47  ;;  %781 = vmatpush.bf16.msrb.mxu1 %v2870_v52 }
  0x7c   :  { %791 = vmatpush.bf16.msra.mxu2 %v2856_v32 }
  0x7d   :  { %804 = vmatpush.bf16.msra.mxu3 %v2839_v16 }
  0x80   :  { %792 = vmatpush.bf16.msra.mxu2 %v2883_v0 }
  0x81   :  { %805 = vmatpush.bf16.msra.mxu3 %v2848_v30 }
  0x84   :  { %793 = vmatpush.bf16.msra.mxu2 %v2890_v6 }
  0x85   :  { %806 = vmatpush.bf16.msra.mxu3 %v2880_v58 }
  0x88   :  { %794 = vmatpush.bf16.msra.mxu2 %v2896_v10 }
  0x89   :  { %807 = vmatpush.bf16.msra.mxu3 %v2887_v60 }
  0x98   :  { %v159_v17 = vpop.f32.mrf.mxu0 }
  0x99   :  { %v188_v19 = vpop.f32.mrf.mxu1 }
  0x9e   :  { %v174_v25 = vpop.f32.mrf.mxu2 }
  0x9f   :  { %v2988_v28 = vadd.f32 %v174_v25, %v2983_v8  ;;  %v203_v29 = vpop.f32.mrf.mxu3  ;;  %v3029_v25 = vperm.slane %v107_v18, 3  ;;  %v160_v18 = vadd.f32 %v159_v17, %v2983_v8 }
  0xa0   :  { %v2991_v37 = vadd.f32 %v203_v29, %v2985_v24  ;;  %v2993_v38 = vpop.f32.mrf.mxu0 }
  0xa1   :  { %3396 = vst [vmem:[#allocation16_spill] sm:$0xff] %v2988_v28  ;;  %v2995_v39 = vpop.f32.mrf.mxu1 }
  0xa2   :  { %3397 = vst [vmem:[#allocation17_spill] sm:$0xff] %v2991_v37  ;;  %v189_v37 = vadd.f32 %v188_v19, %v2985_v24 }
  0xa6   :  { %v2997_v40 = vpop.f32.mrf.mxu2 }
  0xa7   :  { %3398 = vst [vmem:[#allocation18_spill] sm:$0xff] %v2997_v40  ;;  %v2999_v41 = vpop.f32.mrf.mxu3 }
  0xa8   :  { %3399 = vst [vmem:[#allocation19_spill] sm:$0xff] %v2999_v41  ;;  %v164_v43 = vpop.f32.mrf.mxu0 }
  0xa9   :  { %v3002_v48 = vadd.f32 %v164_v43, %v2983_v8  ;;  %v193_v50 = vpop.f32.mrf.mxu1 }
  0xaa   :  { %v3005_v51 = vadd.f32 %v193_v50, %v2985_v24 }
  0xab   :  { %3400 = vst [vmem:[#allocation20_spill] sm:$0xff] %v3002_v48  ;;  %v618_v48 = vpop.permute.xlu0 %617 }
  0xac   :  { %3401 = vst [vmem:[#allocation21_spill] sm:$0xff] %v3005_v51  ;;  %vm619_vm12 = vcmp.eq.s32.totalorder %v618_v48, 1  ;;  %v162_v48 = vadd.f32 %v2993_v38, %v2983_v8 }
  0xad   :  { %vm2121_vm1 = vmpackc.low %vm619_vm12, %vm619_vm12 }
  0xae   :  { %v3007_v53 = vpop.f32.mrf.mxu2 }
  0xaf   :  { %v3009_v55 = vpop.f32.mrf.mxu3 }
  0xb0   :  { %v166_v57 = vpop.f32.mrf.mxu0 }
  0xb1   :  { %v3012_v59 = vadd.f32 %v166_v57, %v2983_v8  ;;  %v195_v61 = vpop.f32.mrf.mxu1 }
  0xb2   :  { %v3015_v62 = vadd.f32 %v195_v61, %v2985_v24 }
  0xb3   :  { %3402 = vst [vmem:[#allocation22_spill] sm:$0xff] %v3012_v59 }
  0xb4   :  { %3403 = vst [vmem:[#allocation23_spill] sm:$0xff] %v3015_v62 }
  0xb6   :  { %v3017_v1 = vpop.f32.mrf.mxu2 }
  0xb7   :  { %3404 = vst [vmem:[#allocation24_spill] sm:$0xff] %v3017_v1  ;;  %v3019_v5 = vpop.f32.mrf.mxu3 }
  0xb8   :  { %v169_v7 = vpop.f32.mrf.mxu0 }
  0xb9   :  { %v3022_v9 = vadd.f32 %v169_v7, %v2983_v8  ;;  %v198_v13 = vpop.f32.mrf.mxu1 }
  0xba   :  { %v3025_v14 = vadd.f32 %v198_v13, %v2985_v24 }
  0xbb   :  { %3405 = vst [vmem:[#allocation25_spill] sm:$0xff] %v3022_v9 }
  0xbc   :  { %3406 = vst [vmem:[#allocation26_spill] sm:$0xff] %v3025_v14 }
  0xbe   :  { %v222_v29 = vpop.f32.mrf.mxu2 }
  0xbf   :  { %v3032_v43 = vadd.f32 %v222_v29, %v3027_v12  ;;  %v251_v50 = vpop.f32.mrf.mxu3 }
  0xc0   :  { %v3035_v57 = vadd.f32 %v251_v50, %v3029_v25  ;;  %v171_v61 = vpop.f32.mrf.mxu0 }
  0xc1   :  { %3407 = vst [vmem:[#allocation27_spill] sm:$0xff] %v3032_v43  ;;  %v3038_v7 = vadd.f32 %v171_v61, %v2983_v8  ;;  %v200_v26 = vpop.f32.mrf.mxu1 }
  0xc2   :  { %3408 = vst [vmem:[#allocation28_spill] sm:$0xff] %v3035_v57  ;;  %v3041_v13 = vadd.f32 %v200_v26, %v2985_v24 }
  0xc3   :  { %3409 = vst [vmem:[#allocation29_spill] sm:$0xff] %v3038_v7 }
  0xc4   :  { %3410 = vst [vmem:[#allocation30_spill] sm:$0xff] %v3041_v13 }
  0xc6   :  { %v224_v41 = vpop.f32.mrf.mxu2 }
  0xc7   :  { %v3045_v40 = vadd.f32 %v224_v41, %v3027_v12  ;;  %v253_v29 = vpop.f32.mrf.mxu3 }
  0xc8   :  { %v3049_v50 = vadd.f32 %v253_v29, %v3029_v25  ;;  %v504_v28 = vpop.f32.mrf.mxu0 }
  0xc9   :  { %3411 = vst [vmem:[#allocation31_spill] sm:$0xff] %v3045_v40  ;;  %v547_v14 = vadd.f32 %v504_v28, %v160_v18  ;;  %v517_v61 = vpop.f32.mrf.mxu1 }
  0xca   :  { %3412 = vst [vmem:[#allocation32_spill] sm:$0xff] %v3049_v50  ;;  %v548_v7 = vadd.f32 %v517_v61, %v189_v37 }
  0xcb   :  { %v2118_v9 = vmul.f32 -1.442695, %v547_v14 }
  0xcc   :  { %v2119_v62 = vmul.f32 -1.442695, %v548_v7 }
  0xcd   :  { %2447 = vpow2.f32 %v2118_v9 }
  0xce   :  { %2449 = vpow2.f32 %v2119_v62  ;;  %v227_v26 = vpop.f32.mrf.mxu2 }
  0xcf   :  { %v3052_v17 = vadd.f32 %v227_v26, %v3027_v12  ;;  %v256_v41 = vpop.f32.mrf.mxu3 }
  0xd0   :  { %v3055_v13 = vadd.f32 %v256_v41, %v3029_v25  ;;  %v506_v19 = vpop.f32.mrf.mxu0 }
  0xd1   :  { %3413 = vst [vmem:[#allocation33_spill] sm:$0xff] %v3052_v17  ;;  %v519_v40 = vpop.f32.mrf.mxu1 }
  0xd2   :  { %3414 = vst [vmem:[#allocation34_spill] sm:$0xff] %v3055_v13 }
  0xd3   :  { %v2448_v29 = vpop.eup %2447 }
  0xd4   :  { %v2450_v50 = vpop.eup %2449  ;;  %v554_v18 = vadd.f32 1.0, %v2448_v29 }
  0xd5   :  { %v573_v59 = vadd.f32 1.0, %v2450_v50 }
  0xd6   :  { %v229_v28 = vpop.f32.mrf.mxu2  ;;  %vm560_vm8 = vweird.f32 %v554_v18 }
  0xd7   :  { %v3058_v37 = vadd.f32 %v229_v28, %v3027_v12  ;;  %v258_v9 = vpop.f32.mrf.mxu3  ;;  %2451 = vrcp.f32 %v573_v59  ;;  %vm579_vm5 = vweird.f32 %v573_v59 }
  0xd8   :  { %v3061_v62 = vadd.f32 %v258_v9, %v3029_v25  ;;  %2453 = vrcp.f32 %v554_v18 }
  0xd9   :  { %3415 = vst [vmem:[#allocation35_spill] sm:$0xff] %v3058_v37 }
  0xda   :  { %3416 = vst [vmem:[#allocation36_spill] sm:$0xff] %v3061_v62 }
  0xdd   :  { %v2452_v7 = vpop.eup %2451 }
  0xde   :  { %v232_v14 = vpop.f32.mrf.mxu2  ;;  %v2454_v50 = vpop.eup %2453  ;;  %v575_v41 = vmul.f32 %v2452_v7, %v573_v59  ;;  %vm580_vm4 = vweird.f32 %v2452_v7 }
  0xdf   :  { %v3064_v61 = vadd.f32 %v232_v14, %v3027_v12  ;;  %v261_v40 = vpop.f32.mrf.mxu3  ;;  %v556_v19 = vmul.f32 %v2454_v50, %v554_v18  ;;  %vm561_vm6 = vweird.f32 %v2454_v50  ;;  %vm581_vm7 = vmor %vm579_vm5, %vm580_vm4 }
  0xe0   :  { %v3067_v26 = vadd.f32 %v261_v40, %v3029_v25  ;;  %v576_v29 = vsub.f32 1.0, %v575_v41  ;;  %v247_v40 = vadd.f32 %v3009_v55, %v3029_v25  ;;  %vm562_vm9 = vmor %vm560_vm8, %vm561_vm6 }
  0xe1   :  { %3417 = vst [vmem:[#allocation37_spill] sm:$0xff] %v3064_v61  ;;  %v557_v62 = vsub.f32 1.0, %v556_v19  ;;  %v218_v61 = vadd.f32 %v3007_v53, %v3027_v12  ;;  %v564_v53 = vand.u32 2147483647, %v554_v18 }
  0xe2   :  { %3418 = vst [vmem:[#allocation38_spill] sm:$0xff] %v3067_v26  ;;  %v577_v13 = vmul.f32 %v2452_v7, %v576_v29  ;;  %v566_v29 = vand.u32 2147483648, %v554_v18 }
  0xe3   :  { %v558_v14 = vmul.f32 %v2454_v50, %v557_v62  ;;  %vm565_vm11 = vcmp.eq.f32.partialorder %v564_v53, 8.507059e+37 }
  0xe4   :  { %v578_v43 = vadd.f32 %v2452_v7, %v577_v13 }
  0xe5   :  { %v559_v19 = vadd.f32 %v2454_v50, %v558_v14 }
  0xe6   :  { %v234_v28 = vpop.f32.mrf.mxu2 }
  0xe7   :  { %v3070_v37 = vadd.f32 %v234_v28, %v3027_v12  ;;  %v263_v9 = vpop.f32.mrf.mxu3  ;;  %v585_v28 = vand.u32 2147483648, %v573_v59  ;;  %v563_v13 = vsel %vm562_vm9, %v2454_v50, %v559_v19 }
  0xe8   :  { %v3073_v17 = vadd.f32 %v263_v9, %v3029_v25  ;;  %v583_v9 = vand.u32 2147483647, %v573_v59 }
  0xe9   :  { %3419 = vst [vmem:[#allocation39_spill] sm:$0xff] %v3070_v37  ;;  %v586_v55 = vor.u32 1.1754944e-38, %v585_v28 }
  0xea   :  { %3420 = vst [vmem:[#allocation40_spill] sm:$0xff] %v3073_v17  ;;  %v582_v17 = vsel %vm581_vm7, %v2452_v7, %v578_v43  ;;  %vm584_vm10 = vcmp.eq.f32.partialorder %v583_v9, 8.507059e+37 }
  0xee   :  { %v530_v26 = vpop.f32.mrf.mxu2 }
  0xef   :  { %v549_v41 = vadd.f32 %v530_v26, %v218_v61  ;;  %v543_v57 = vpop.f32.mrf.mxu3  ;;  %v567_v61 = vor.u32 1.1754944e-38, %v566_v29  ;;  %v587_v26 = vsel %vm584_vm10, %v586_v55, %v582_v17 }
  0xf0   :  { %v550_v37 = vadd.f32 %v543_v57, %v247_v40  ;;  %v609_v40 = vmul.f32 0.0, %v587_v26 }
  0xf1   :  { %2455 = vtanh.f32 %v549_v41  ;;  %v568_v59 = vsel %vm565_vm11, %v567_v61, %v563_v13  ;;  %vm1545_vm11 = vcmp.gt.s32.totalorder %v2913_v11, 7 }
  0xf2   :  { %v2120_v62 = vmul.f32 -1.442695, %v550_v37 }
  0xf4   :  { %2457 = vpow2.f32 %v2120_v62 }
  0xf6   :  { %v532_v51 = vpop.f32.mrf.mxu2 }
  0xf7   :  { %v2456_v57 = vpop.eup %2455  ;;  %v545_v14 = vpop.f32.mrf.mxu3 }
  0xf8   :  { %v610_v41 = vmul.f32 %v2456_v57, %v568_v59 }
  0xfa   :  { %v2458_v37 = vpop.eup %2457  ;;  %v611_v1 = vadd.f32 %v610_v41, %v609_v40 }
  0xfb   :  { %v593_v18 = vadd.f32 1.0, %v2458_v37 }
  0xfc   :  { %v3080_v43 = vsel %vm619_vm12, %v611_v1, 0.0 }
  0xfd   :  { %2459 = vrcp.f32 %v593_v18  ;;  %v605_v17 = vand.u32 2147483648, %v593_v18  ;;  %v603_v19 = vand.u32 2147483647, %v593_v18  ;;  %vm599_vm14 = vweird.f32 %v593_v18 }
  0xfe   :  { %2461 = vtanh.f32 %v611_v1  ;;  %v191_v1 = vadd.f32 %v2995_v39, %v2985_v24 }
  0xff   :  { %v606_v29 = vor.u32 1.1754944e-38, %v605_v17  ;;  %vm604_vm0 = vcmp.eq.f32.partialorder %v603_v19, 8.507059e+37 }
 0x103   :  { %v2460_v7 = vpop.eup %2459 }
 0x104   :  { %v595_v50 = vmul.f32 %v2460_v7, %v593_v18  ;;  %vm600_vm13 = vweird.f32 %v2460_v7  ;;  %v2462_v53 = vpop.eup %2461  ;;  %v249_v18 = vadd.f32 %v3019_v5, %v3029_v25  ;;  %v3421_v5 = vld [vmem:[#allocation24_spill] sm:$0xff] }
 0x105   :  { %vm601_vm15 = vmor %vm599_vm14, %vm600_vm13  ;;  %v220_v25 = vadd.f32 %v3421_v5, %v3027_v12 }
 0x106   :  { %v596_v28 = vsub.f32 1.0, %v595_v50 }
 0x108   :  { %v597_v51 = vmul.f32 %v2460_v7, %v596_v28 }
 0x10a   :  { %v598_v9 = vadd.f32 %v2460_v7, %v597_v51 }
 0x10c   :  { %v602_v62 = vsel %vm601_vm15, %v2460_v7, %v598_v9 }
 0x10d   :  { %v607_v55 = vsel %vm604_vm0, %v606_v29, %v602_v62 }
 0x10e   :  { %v613_v13 = vmul.f32 %v2462_v53, %v607_v55 }
 0x110   :  { %v3085_v61 = vsel %vm619_vm12, %v613_v13, 0.0  ;;  %v2122_v26 = vpack.c.bf16 %v613_v13, %v613_v13  ;;  %v3422_v13 = vmov 0  }
 0x112   :  { %2123 = vmatmul.msk.bf16.vlgmr.msra.gmra.mxu0 %vm2121_vm1, %v2122_v26  ;;  %2126 = vmatmul.msk.bf16.vlgmr.msra.gmra.mxu1 %vm2121_vm1, %v2122_v26 }
 0x113   :  { %2129 = vmatmul.msk.bf16.vlgmr.msrb.gmra.mxu2 %vm2121_vm1, %v2122_v26  ;;  %2132 = vmatmul.msk.bf16.vlgmr.msrb.gmra.mxu3 %vm2121_vm1, %v2122_v26  ;;  %v881_v26 = vsel %vm880_vm2, 1, %v3422_v13 }
 0x114   :  { %894 = vmatpush.bf16.msra.mxu0 %v2778_v23  ;;  %907 = vmatpush.bf16.msra.mxu1 %v2784_v27 }
 0x115   :  { %920 = vmatpush.bf16.msrb.mxu2 %v2795_v42  ;;  %933 = vmatpush.bf16.msrb.mxu3 %v2776_v22 }
 0x116   :  { %883 = vperm.xlu1 %2445, %v881_v26  }
 0x118   :  { %895 = vmatpush.bf16.msra.mxu0 %v2788_v33  ;;  %908 = vmatpush.bf16.msra.mxu1 %v2793_v36 }
 0x119   :  { %921 = vmatpush.bf16.msrb.mxu2 %v2807_v54  ;;  %934 = vmatpush.bf16.msrb.mxu3 %v2790_v34 }
 0x11c   :  { %896 = vmatpush.bf16.msra.mxu0 %v2799_v44  ;;  %909 = vmatpush.bf16.msra.mxu1 %v2802_v46 }
 0x11d   :  { %922 = vmatpush.bf16.msrb.mxu2 %v2821_v3  ;;  %935 = vmatpush.bf16.msrb.mxu3 %v2805_v49 }
 0x120   :  { %897 = vmatpush.bf16.msra.mxu0 %v2810_v56  ;;  %910 = vmatpush.bf16.msra.mxu1 %v2819_v2 }
 0x121   :  { %923 = vmatpush.bf16.msrb.mxu2 %v2844_v21  ;;  %936 = vmatpush.bf16.msrb.mxu3 %v2817_v63 }
 0x124   :  { %898 = vmatpush.bf16.msra.mxu0 %v2824_v4  ;;  %911 = vmatpush.bf16.msra.mxu1 %v2836_v15 }
 0x125   :  { %924 = vmatpush.bf16.msrb.mxu2 %v2856_v32  ;;  %937 = vmatpush.bf16.msrb.mxu3 %v2839_v16 }
 0x128   :  { %899 = vmatpush.bf16.msra.mxu0 %v2842_v20  ;;  %912 = vmatpush.bf16.msra.mxu1 %v2853_v31 }
 0x129   :  { %925 = vmatpush.bf16.msrb.mxu2 %v2883_v0  ;;  %938 = vmatpush.bf16.msrb.mxu3 %v2848_v30 }
 0x12c   :  { %900 = vmatpush.bf16.msra.mxu0 %v2859_v35  ;;  %913 = vmatpush.bf16.msra.mxu1 %v2863_v45 }
 0x12d   :  { %926 = vmatpush.bf16.msrb.mxu2 %v2890_v6  ;;  %939 = vmatpush.bf16.msrb.mxu3 %v2880_v58 }
 0x130   :  { %901 = vmatpush.bf16.msra.mxu0 %v2867_v47  ;;  %914 = vmatpush.bf16.msra.mxu1 %v2870_v52 }
 0x131   :  { %927 = vmatpush.bf16.msrb.mxu2 %v2896_v10  ;;  %940 = vmatpush.bf16.msrb.mxu3 %v2887_v60 }
 0x18f   :  { %v637_v57 = vpop.f32.mrf.mxu0  ;;  %v650_v14 = vpop.f32.mrf.mxu1 }
 0x190   :  { %v680_v59 = vadd.f32 %v637_v57, %v162_v48  ;;  %v681_v40 = vadd.f32 %v650_v14, %v191_v1 }
 0x192   :  { %v2133_v41 = vmul.f32 -1.442695, %v680_v59  ;;  %v2134_v37 = vmul.f32 -1.442695, %v681_v40 }
 0x194   :  { %2463 = vpow2.f32 %v2133_v41 }
 0x195   :  { %2465 = vpow2.f32 %v2134_v37 }
 0x196   :  { %v663_v7 = vpop.f32.mrf.mxu2  ;;  %v676_v50 = vpop.f32.mrf.mxu3 }
 0x197   :  { %v683_v28 = vadd.f32 %v676_v50, %v249_v18  ;;  %v639_v17 = vpop.f32.mrf.mxu0  ;;  %v652_v51 = vpop.f32.mrf.mxu1  ;;  %v682_v57 = vadd.f32 %v663_v7, %v220_v25  ;;  %v1014_v50 = vsel %vm1013_vm3, 1, %v3422_v13 }
 0x198   :  { %1016 = vperm.xlu1 %2445, %v1014_v50  }
 0x199   :  { %v2135_v38 = vmul.f32 -1.442695, %v683_v28 }
 0x19a   :  { %v2464_v19 = vpop.eup %2463 }
 0x19b   :  { %v2466_v9 = vpop.eup %2465  ;;  %v687_v39 = vadd.f32 1.0, %v2464_v19  ;;  %2467 = vpow2.f32 %v2135_v38 }
 0x19c   :  { %v706_v29 = vadd.f32 1.0, %v2466_v9 }
 0x19d   :  { %2469 = vrcp.f32 %v687_v39  ;;  %v699_v18 = vand.u32 2147483648, %v687_v39  ;;  %v697_v17 = vand.u32 2147483647, %v687_v39  ;;  %vm693_vm6 = vweird.f32 %v687_v39 }
 0x19e   :  { %2471 = vrcp.f32 %v706_v29  ;;  %v665_v62 = vpop.f32.mrf.mxu2  ;;  %v678_v53 = vpop.f32.mrf.mxu3  ;;  %v718_v28 = vand.u32 2147483648, %v706_v29  ;;  %v716_v38 = vand.u32 2147483647, %v706_v29  ;;  %vm712_vm7 = vweird.f32 %v706_v29 }
 0x19f   :  { %v700_v9 = vor.u32 1.1754944e-38, %v699_v18  ;;  %vm698_vm10 = vcmp.eq.f32.partialorder %v697_v17, 8.507059e+37  ;;  %v751_v18 = vpop.permute.xlu0 %750 }
 0x1a0   :  { %vm717_vm12 = vcmp.eq.f32.partialorder %v716_v38, 8.507059e+37  ;;  %vm752_vm13 = vcmp.eq.s32.totalorder %v751_v18, 1 }
 0x1a1   :  { %v2468_v55 = vpop.eup %2467 }
 0x1a2   :  { %v726_v48 = vadd.f32 1.0, %v2468_v55  ;;  %v719_v55 = vor.u32 1.1754944e-38, %v718_v28 }
 0x1a3   :  { %v2470_v1 = vpop.eup %2469 }
 0x1a4   :  { %v2472_v14 = vpop.eup %2471  ;;  %v689_v59 = vmul.f32 %v2470_v1, %v687_v39  ;;  %2473 = vrcp.f32 %v726_v48  ;;  %vm694_vm4 = vweird.f32 %v2470_v1  ;;  %v738_v11 = vand.u32 2147483648, %v726_v48 }
 0x1a5   :  { %v708_v40 = vmul.f32 %v2472_v14, %v706_v29  ;;  %2475 = vtanh.f32 %v682_v57  ;;  %vm713_vm5 = vweird.f32 %v2472_v14  ;;  %vm695_vm8 = vmor %vm693_vm6, %vm694_vm4  ;;  %vm732_vm15 = vweird.f32 %v726_v48 }
 0x1a6   :  { %v690_v41 = vsub.f32 1.0, %v689_v59  ;;  %vm714_vm9 = vmor %vm712_vm7, %vm713_vm5  ;;  %v739_v17 = vor.u32 1.1754944e-38, %v738_v11 }
 0x1a7   :  { %v709_v37 = vsub.f32 1.0, %v708_v40 }
 0x1a8   :  { %v691_v12 = vmul.f32 %v2470_v1, %v690_v41 }
 0x1a9   :  { %v710_v51 = vmul.f32 %v2472_v14, %v709_v37  ;;  %v1546_v37 = vsel %vm1545_vm11, 1, %v3422_v13 }
 0x1aa   :  { %v2474_v7 = vpop.eup %2473  ;;  %v692_v19 = vadd.f32 %v2470_v1, %v691_v12  ;;  %1548 = vperm.xlu1 %2445, %v1546_v37  }
 0x1ab   :  { %v711_v62 = vadd.f32 %v2472_v14, %v710_v51  ;;  %v728_v53 = vmul.f32 %v2474_v7, %v726_v48  ;;  %v2476_v25 = vpop.eup %2475  ;;  %vm733_vm14 = vweird.f32 %v2474_v7 }
 0x1ac   :  { %v696_v5 = vsel %vm695_vm8, %v2470_v1, %v692_v19  ;;  %vm734_vm0 = vmor %vm732_vm15, %vm733_vm14 }
 0x1ad   :  { %v701_v26 = vsel %vm698_vm10, %v700_v9, %v696_v5  ;;  %v715_v57 = vsel %vm714_vm9, %v2472_v14, %v711_v62  ;;  %v729_v59 = vsub.f32 1.0, %v728_v53  ;;  %v736_v14 = vand.u32 2147483647, %v726_v48  ;;  %v3423_v48 = vld [vmem:[#allocation20_spill] sm:$0xff]  ;;  %v3424_v53 = vld [vmem:[#allocation21_spill] sm:$0xff] }
 0x1ae   :  { %v720_v40 = vsel %vm717_vm12, %v719_v55, %v715_v57  ;;  %v743_v41 = vmul.f32 %v2476_v25, %v701_v26 }
 0x1af   :  { %v742_v39 = vmul.f32 %v720_v40, %v3080_v43  ;;  %v730_v29 = vmul.f32 %v2474_v7, %v729_v59  ;;  %vm737_vm1 = vcmp.eq.f32.partialorder %v736_v14, 8.507059e+37  ;;  %v3425_v59 = vld [vmem:[#allocation28_spill] sm:$0xff] }
 0x1b1   :  { %v744_v50 = vadd.f32 %v743_v41, %v742_v39  ;;  %v731_v28 = vadd.f32 %v2474_v7, %v730_v29 }
 0x1b3   :  { %2477 = vtanh.f32 %v744_v50  ;;  %v3136_v1 = vsel %vm752_vm13, %v744_v50, %v3080_v43  ;;  %v735_v12 = vsel %vm734_vm0, %v2474_v7, %v731_v28 }
 0x1b4   :  { %v740_v38 = vsel %vm737_vm1, %v739_v17, %v735_v12 }
 0x1b9   :  { %v2478_v51 = vpop.eup %2477 }
 0x1ba   :  { %v746_v19 = vmul.f32 %v2478_v51, %v740_v38  ;;  %v3426_v38 = vld [vmem:[#allocation27_spill] sm:$0xff] }
 0x1bc   :  { %v3140_v9 = vsel %vm752_vm13, %v746_v19, %v3085_v61 }
 0x1bd   :  { %v760_v62 = vpack.c.bf16 %v3140_v9, %v3140_v9 }
 0x1bf   :  { %769 = vmatmul.bf16.vlgmr.msrb.gmra.mxu0 %v760_v62  ;;  %782 = vmatmul.bf16.vlgmr.msrb.gmra.mxu1 %v760_v62 }
 0x1c0   :  { %795 = vmatmul.bf16.vlgmr.msra.gmra.mxu2 %v760_v62  ;;  %808 = vmatmul.bf16.vlgmr.msra.gmra.mxu3 %v760_v62 }
 0x1c1   :  { %1027 = vmatpush.bf16.msrb.mxu0 %v2778_v23  ;;  %1040 = vmatpush.bf16.msrb.mxu1 %v2784_v27 }
 0x1c2   :  { %1053 = vmatpush.bf16.msra.mxu2 %v2795_v42  ;;  %1066 = vmatpush.bf16.msra.mxu3 %v2776_v22 }
 0x1c5   :  { %1028 = vmatpush.bf16.msrb.mxu0 %v2788_v33  ;;  %1041 = vmatpush.bf16.msrb.mxu1 %v2793_v36 }
 0x1c6   :  { %1054 = vmatpush.bf16.msra.mxu2 %v2807_v54  ;;  %1067 = vmatpush.bf16.msra.mxu3 %v2790_v34 }
 0x1c9   :  { %1029 = vmatpush.bf16.msrb.mxu0 %v2799_v44  ;;  %1042 = vmatpush.bf16.msrb.mxu1 %v2802_v46 }
 0x1ca   :  { %1055 = vmatpush.bf16.msra.mxu2 %v2821_v3  ;;  %1068 = vmatpush.bf16.msra.mxu3 %v2805_v49 }
 0x1cd   :  { %1030 = vmatpush.bf16.msrb.mxu0 %v2810_v56  ;;  %1043 = vmatpush.bf16.msrb.mxu1 %v2819_v2 }
 0x1ce   :  { %1056 = vmatpush.bf16.msra.mxu2 %v2844_v21  ;;  %1069 = vmatpush.bf16.msra.mxu3 %v2817_v63 }
 0x1d1   :  { %1031 = vmatpush.bf16.msrb.mxu0 %v2824_v4  ;;  %1044 = vmatpush.bf16.msrb.mxu1 %v2836_v15 }
 0x1d2   :  { %1057 = vmatpush.bf16.msra.mxu2 %v2856_v32  ;;  %1070 = vmatpush.bf16.msra.mxu3 %v2839_v16 }
 0x1d5   :  { %1032 = vmatpush.bf16.msrb.mxu0 %v2842_v20  ;;  %1045 = vmatpush.bf16.msrb.mxu1 %v2853_v31 }
 0x1d6   :  { %1058 = vmatpush.bf16.msra.mxu2 %v2883_v0  ;;  %1071 = vmatpush.bf16.msra.mxu3 %v2848_v30 }
 0x1d9   :  { %1033 = vmatpush.bf16.msrb.mxu0 %v2859_v35  ;;  %1046 = vmatpush.bf16.msrb.mxu1 %v2863_v45 }
 0x1da   :  { %1059 = vmatpush.bf16.msra.mxu2 %v2890_v6  ;;  %1072 = vmatpush.bf16.msra.mxu3 %v2880_v58 }
 0x1dd   :  { %1034 = vmatpush.bf16.msrb.mxu0 %v2867_v47  ;;  %1047 = vmatpush.bf16.msrb.mxu1 %v2870_v52 }
 0x1de   :  { %1060 = vmatpush.bf16.msra.mxu2 %v2896_v10  ;;  %1073 = vmatpush.bf16.msra.mxu3 %v2887_v60 }
 0x23c   :  { %v770_v43 = vpop.f32.mrf.mxu0  ;;  %v783_v61 = vpop.f32.mrf.mxu1 }
 0x23d   :  { %v813_v7 = vadd.f32 %v770_v43, %v3423_v48  ;;  %v814_v55 = vadd.f32 %v783_v61, %v3424_v53 }
 0x23f   :  { %v2136_v5 = vmul.f32 -1.442695, %v813_v7  ;;  %v2137_v25 = vmul.f32 -1.442695, %v814_v55 }
 0x241   :  { %2479 = vpow2.f32 %v2136_v5 }
 0x242   :  { %2481 = vpow2.f32 %v2137_v25 }
 0x243   :  { %v796_v26 = vpop.f32.mrf.mxu2  ;;  %v809_v57 = vpop.f32.mrf.mxu3 }
 0x244   :  { %v816_v40 = vadd.f32 %v809_v57, %v3425_v59  ;;  %v772_v41 = vpop.f32.mrf.mxu0  ;;  %v785_v39 = vpop.f32.mrf.mxu1  ;;  %v815_v19 = vadd.f32 %v796_v26, %v3426_v38 }
 0x246   :  { %v2138_v29 = vmul.f32 -1.442695, %v816_v40 }
 0x247   :  { %v2480_v37 = vpop.eup %2479 }
 0x248   :  { %v2482_v18 = vpop.eup %2481  ;;  %v820_v50 = vadd.f32 1.0, %v2480_v37  ;;  %2483 = vpow2.f32 %v2138_v29 }
 0x249   :  { %v839_v28 = vadd.f32 1.0, %v2482_v18 }
 0x24a   :  { %2485 = vrcp.f32 %v820_v50  ;;  %v832_v53 = vand.u32 2147483648, %v820_v50  ;;  %v830_v5 = vand.u32 2147483647, %v820_v50  ;;  %vm826_vm4 = vweird.f32 %v820_v50 }
 0x24b   :  { %2487 = vrcp.f32 %v839_v28  ;;  %v798_v11 = vpop.f32.mrf.mxu2  ;;  %v811_v14 = vpop.f32.mrf.mxu3  ;;  %v851_v25 = vand.u32 2147483648, %v839_v28  ;;  %v849_v59 = vand.u32 2147483647, %v839_v28  ;;  %vm845_vm6 = vweird.f32 %v839_v28 }
 0x24c   :  { %v833_v26 = vor.u32 1.1754944e-38, %v832_v53  ;;  %vm831_vm7 = vcmp.eq.f32.partialorder %v830_v5, 8.507059e+37 }
 0x24d   :  { %v852_v18 = vor.u32 1.1754944e-38, %v851_v25  ;;  %vm850_vm9 = vcmp.eq.f32.partialorder %v849_v59, 8.507059e+37 }
 0x24e   :  { %v2484_v12 = vpop.eup %2483 }
 0x24f   :  { %v859_v17 = vadd.f32 1.0, %v2484_v12 }
 0x250   :  { %v2486_v51 = vpop.eup %2485 }
 0x251   :  { %v2488_v62 = vpop.eup %2487  ;;  %v822_v43 = vmul.f32 %v2486_v51, %v820_v50  ;;  %2489 = vrcp.f32 %v859_v17  ;;  %vm827_vm2 = vweird.f32 %v2486_v51  ;;  %vm865_vm12 = vweird.f32 %v859_v17 }
 0x252   :  { %v841_v61 = vmul.f32 %v2488_v62, %v839_v28  ;;  %2491 = vtanh.f32 %v815_v19  ;;  %vm846_vm3 = vweird.f32 %v2488_v62  ;;  %vm828_vm5 = vmor %vm826_vm4, %vm827_vm2  ;;  %v871_v28 = vand.u32 2147483648, %v859_v17 }
 0x253   :  { %v823_v48 = vsub.f32 1.0, %v822_v43  ;;  %vm847_vm8 = vmor %vm845_vm6, %vm846_vm3 }
 0x254   :  { %v842_v7 = vsub.f32 1.0, %v841_v61  ;;  %v884_v61 = vpop.permute.xlu1 %883  ;;  %v872_v5 = vor.u32 1.1754944e-38, %v871_v28 }
 0x255   :  { %v824_v55 = vmul.f32 %v2486_v51, %v823_v48  ;;  %vm885_vm10 = vcmp.eq.s32.totalorder %v884_v61, 1 }
 0x256   :  { %v843_v57 = vmul.f32 %v2488_v62, %v842_v7 }
 0x257   :  { %v2490_v40 = vpop.eup %2489  ;;  %v825_v41 = vadd.f32 %v2486_v51, %v824_v55  ;;  %v869_v55 = vand.u32 2147483647, %v859_v17 }
 0x258   :  { %v861_v39 = vmul.f32 %v2490_v40, %v859_v17  ;;  %v844_v29 = vadd.f32 %v2488_v62, %v843_v57  ;;  %v2492_v11 = vpop.eup %2491  ;;  %vm866_vm11 = vweird.f32 %v2490_v40  ;;  %v3427_v17 = vld [vmem:[#allocation22_spill] sm:$0xff] }
 0x259   :  { %v829_v37 = vsel %vm828_vm5, %v2486_v51, %v825_v41  ;;  %vm867_vm13 = vmor %vm865_vm12, %vm866_vm11  ;;  %vm870_vm14 = vcmp.eq.f32.partialorder %v869_v55, 8.507059e+37 }
 0x25a   :  { %v834_v14 = vsel %vm831_vm7, %v833_v26, %v829_v37  ;;  %v862_v12 = vsub.f32 1.0, %v861_v39  ;;  %v848_v38 = vsel %vm847_vm8, %v2488_v62, %v844_v29  ;;  %v3428_v39 = vld [vmem:[#allocation23_spill] sm:$0xff] }
 0x25b   :  { %v876_v19 = vmul.f32 %v2492_v11, %v834_v14  ;;  %v853_v43 = vsel %vm850_vm9, %v852_v18, %v848_v38 }
 0x25c   :  { %v863_v48 = vmul.f32 %v2490_v40, %v862_v12  ;;  %v875_v50 = vmul.f32 %v853_v43, %v3136_v1  ;;  %v3429_v12 = vld [vmem:[#allocation32_spill] sm:$0xff] }
 0x25e   :  { %v877_v7 = vadd.f32 %v876_v19, %v875_v50  ;;  %v864_v53 = vadd.f32 %v2490_v40, %v863_v48 }
 0x260   :  { %2493 = vtanh.f32 %v877_v7  ;;  %v3183_v51 = vsel %vm885_vm10, %v877_v7, %v3136_v1  ;;  %v868_v62 = vsel %vm867_vm13, %v2490_v40, %v864_v53 }
 0x261   :  { %v873_v57 = vsel %vm870_vm14, %v872_v5, %v868_v62  ;;  %v2575_v62 = vld [vmem:[%s3387_s1] sm:$0xff] }
 0x262   :  { %vm1146_vm15 = vcmp.gt.s32.totalorder %v2575_v62, 4  ;;  %vm1279_vm0 = vcmp.gt.s32.totalorder %v2575_v62, 5 }
 0x266   :  { %v2494_v25 = vpop.eup %2493 }
 0x267   :  { %v879_v59 = vmul.f32 %v2494_v25, %v873_v57  ;;  %v1147_v25 = vsel %vm1146_vm15, 1, %v3422_v13 }
 0x268   :  { %1149 = vperm.xlu2 %2446, %v1147_v25  }
 0x269   :  { %v3187_v41 = vsel %vm885_vm10, %v879_v59, %v3140_v9 }
 0x26a   :  { %v893_v26 = vpack.c.bf16 %v3187_v41, %v3187_v41 }
 0x26c   :  { %902 = vmatmul.bf16.vlgmr.msra.gmra.mxu0 %v893_v26  ;;  %915 = vmatmul.bf16.vlgmr.msra.gmra.mxu1 %v893_v26 }
 0x26d   :  { %928 = vmatmul.bf16.vlgmr.msrb.gmra.mxu2 %v893_v26  ;;  %941 = vmatmul.bf16.vlgmr.msrb.gmra.mxu3 %v893_v26  ;;  %v3430_v26 = vld [vmem:[#allocation31_spill] sm:$0xff] }
 0x26e   :  { %1160 = vmatpush.bf16.msra.mxu0 %v2778_v23  ;;  %1173 = vmatpush.bf16.msra.mxu1 %v2784_v27 }
 0x26f   :  { %1186 = vmatpush.bf16.msrb.mxu2 %v2795_v42  ;;  %1199 = vmatpush.bf16.msrb.mxu3 %v2776_v22 }
 0x272   :  { %1161 = vmatpush.bf16.msra.mxu0 %v2788_v33  ;;  %1174 = vmatpush.bf16.msra.mxu1 %v2793_v36 }
 0x273   :  { %1187 = vmatpush.bf16.msrb.mxu2 %v2807_v54  ;;  %1200 = vmatpush.bf16.msrb.mxu3 %v2790_v34 }
 0x276   :  { %1162 = vmatpush.bf16.msra.mxu0 %v2799_v44  ;;  %1175 = vmatpush.bf16.msra.mxu1 %v2802_v46 }
 0x277   :  { %1188 = vmatpush.bf16.msrb.mxu2 %v2821_v3  ;;  %1201 = vmatpush.bf16.msrb.mxu3 %v2805_v49 }
 0x27a   :  { %1163 = vmatpush.bf16.msra.mxu0 %v2810_v56  ;;  %1176 = vmatpush.bf16.msra.mxu1 %v2819_v2 }
 0x27b   :  { %1189 = vmatpush.bf16.msrb.mxu2 %v2844_v21  ;;  %1202 = vmatpush.bf16.msrb.mxu3 %v2817_v63 }
 0x27e   :  { %1164 = vmatpush.bf16.msra.mxu0 %v2824_v4  ;;  %1177 = vmatpush.bf16.msra.mxu1 %v2836_v15 }
 0x27f   :  { %1190 = vmatpush.bf16.msrb.mxu2 %v2856_v32  ;;  %1203 = vmatpush.bf16.msrb.mxu3 %v2839_v16 }
 0x282   :  { %1165 = vmatpush.bf16.msra.mxu0 %v2842_v20  ;;  %1178 = vmatpush.bf16.msra.mxu1 %v2853_v31 }
 0x283   :  { %1191 = vmatpush.bf16.msrb.mxu2 %v2883_v0  ;;  %1204 = vmatpush.bf16.msrb.mxu3 %v2848_v30 }
 0x286   :  { %1166 = vmatpush.bf16.msra.mxu0 %v2859_v35  ;;  %1179 = vmatpush.bf16.msra.mxu1 %v2863_v45 }
 0x287   :  { %1192 = vmatpush.bf16.msrb.mxu2 %v2890_v6  ;;  %1205 = vmatpush.bf16.msrb.mxu3 %v2880_v58 }
 0x28a   :  { %1167 = vmatpush.bf16.msra.mxu0 %v2867_v47  ;;  %1180 = vmatpush.bf16.msra.mxu1 %v2870_v52 }
 0x28b   :  { %1193 = vmatpush.bf16.msrb.mxu2 %v2896_v10  ;;  %1206 = vmatpush.bf16.msrb.mxu3 %v2887_v60 }
 0x2e9   :  { %v903_v1 = vpop.f32.mrf.mxu0  ;;  %v916_v9 = vpop.f32.mrf.mxu1 }
 0x2ea   :  { %v946_v40 = vadd.f32 %v903_v1, %v3427_v17  ;;  %v947_v29 = vadd.f32 %v916_v9, %v3428_v39 }
 0x2ec   :  { %v2139_v37 = vmul.f32 -1.442695, %v946_v40  ;;  %v2140_v18 = vmul.f32 -1.442695, %v947_v29 }
 0x2ee   :  { %2495 = vpow2.f32 %v2139_v37 }
 0x2ef   :  { %2497 = vpow2.f32 %v2140_v18  ;;  %v1280_v18 = vsel %vm1279_vm0, 1, %v3422_v13 }
 0x2f0   :  { %v929_v11 = vpop.f32.mrf.mxu2  ;;  %v942_v14 = vpop.f32.mrf.mxu3  ;;  %1282 = vperm.xlu2 %2446, %v1280_v18  }
 0x2f1   :  { %v949_v38 = vadd.f32 %v942_v14, %v3429_v12  ;;  %v905_v19 = vpop.f32.mrf.mxu0  ;;  %v918_v43 = vpop.f32.mrf.mxu1  ;;  %v948_v1 = vadd.f32 %v929_v11, %v3430_v26 }
 0x2f3   :  { %v2141_v61 = vmul.f32 -1.442695, %v949_v38 }
 0x2f4   :  { %v2496_v48 = vpop.eup %2495 }
 0x2f5   :  { %v2498_v50 = vpop.eup %2497  ;;  %v953_v7 = vadd.f32 1.0, %v2496_v48  ;;  %2499 = vpow2.f32 %v2141_v61 }
 0x2f6   :  { %v972_v53 = vadd.f32 1.0, %v2498_v50 }
 0x2f7   :  { %2501 = vrcp.f32 %v953_v7  ;;  %v965_v37 = vand.u32 2147483648, %v953_v7  ;;  %v963_v38 = vand.u32 2147483647, %v953_v7  ;;  %vm959_vm3 = vweird.f32 %v953_v7 }
 0x2f8   :  { %2503 = vrcp.f32 %v972_v53  ;;  %v931_v28 = vpop.f32.mrf.mxu2  ;;  %v944_v55 = vpop.f32.mrf.mxu3  ;;  %v984_v14 = vand.u32 2147483648, %v972_v53  ;;  %v982_v43 = vand.u32 2147483647, %v972_v53  ;;  %vm978_vm4 = vweird.f32 %v972_v53 }
 0x2f9   :  { %v966_v48 = vor.u32 1.1754944e-38, %v965_v37  ;;  %vm964_vm7 = vcmp.eq.f32.partialorder %v963_v38, 8.507059e+37 }
 0x2fa   :  { %v985_v55 = vor.u32 1.1754944e-38, %v984_v14  ;;  %vm983_vm8 = vcmp.eq.f32.partialorder %v982_v43, 8.507059e+37 }
 0x2fb   :  { %v2500_v5 = vpop.eup %2499 }
 0x2fc   :  { %v992_v57 = vadd.f32 1.0, %v2500_v5 }
 0x2fd   :  { %v2502_v59 = vpop.eup %2501 }
 0x2fe   :  { %v2504_v9 = vpop.eup %2503  ;;  %v955_v17 = vmul.f32 %v2502_v59, %v953_v7  ;;  %2505 = vrcp.f32 %v992_v57  ;;  %vm960_vm1 = vweird.f32 %v2502_v59  ;;  %v1004_v37 = vand.u32 2147483648, %v992_v57 }
 0x2ff   :  { %v974_v40 = vmul.f32 %v2504_v9, %v972_v53  ;;  %2507 = vtanh.f32 %v948_v1  ;;  %vm979_vm2 = vweird.f32 %v2504_v9  ;;  %vm961_vm5 = vmor %vm959_vm3, %vm960_vm1  ;;  %vm998_vm11 = vweird.f32 %v992_v57 }
 0x300   :  { %v956_v39 = vsub.f32 1.0, %v955_v17  ;;  %vm980_vm6 = vmor %vm978_vm4, %vm979_vm2  ;;  %v1002_v18 = vand.u32 2147483647, %v992_v57  ;;  %v1005_v14 = vor.u32 1.1754944e-38, %v1004_v37 }
 0x301   :  { %v975_v29 = vsub.f32 1.0, %v974_v40 }
 0x302   :  { %v957_v12 = vmul.f32 %v2502_v59, %v956_v39  ;;  %v1017_v39 = vpop.permute.xlu1 %1016  ;;  %vm1003_vm13 = vcmp.eq.f32.partialorder %v1002_v18, 8.507059e+37 }
 0x303   :  { %v976_v19 = vmul.f32 %v2504_v9, %v975_v29  ;;  %vm1018_vm9 = vcmp.eq.s32.totalorder %v1017_v39, 1 }
 0x304   :  { %v2506_v61 = vpop.eup %2505  ;;  %v958_v11 = vadd.f32 %v2502_v59, %v957_v12 }
 0x305   :  { %v977_v50 = vadd.f32 %v2504_v9, %v976_v19  ;;  %v994_v28 = vmul.f32 %v2506_v61, %v992_v57  ;;  %v2508_v13 = vpop.eup %2507  ;;  %vm999_vm10 = vweird.f32 %v2506_v61  ;;  %v3431_v57 = vld [vmem:[#allocation25_spill] sm:$0xff] }
 0x306   :  { %v962_v62 = vsel %vm961_vm5, %v2502_v59, %v958_v11  ;;  %vm1000_vm12 = vmor %vm998_vm11, %vm999_vm10 }
 0x307   :  { %v967_v5 = vsel %vm964_vm7, %v966_v48, %v962_v62  ;;  %v981_v25 = vsel %vm980_vm6, %v2504_v9, %v977_v50  ;;  %v995_v26 = vsub.f32 1.0, %v994_v28  ;;  %v3432_v48 = vld [vmem:[#allocation26_spill] sm:$0xff] }
 0x308   :  { %v986_v1 = vsel %vm983_vm8, %v985_v55, %v981_v25  ;;  %v1009_v17 = vmul.f32 %v2508_v13, %v967_v5  ;;  %v3433_v5 = vld [vmem:[#allocation34_spill] sm:$0xff] }
 0x309   :  { %v1008_v40 = vmul.f32 %v986_v1, %v3183_v51  ;;  %v996_v7 = vmul.f32 %v2506_v61, %v995_v26 }
 0x30b   :  { %v1010_v53 = vadd.f32 %v1009_v17, %v1008_v40  ;;  %v997_v29 = vadd.f32 %v2506_v61, %v996_v7 }
 0x30d   :  { %2509 = vtanh.f32 %v1010_v53  ;;  %v3234_v59 = vsel %vm1018_vm9, %v1010_v53, %v3183_v51  ;;  %v1001_v9 = vsel %vm1000_vm12, %v2506_v61, %v997_v29 }
 0x30e   :  { %v1006_v38 = vsel %vm1003_vm13, %v1005_v14, %v1001_v9 }
 0x313   :  { %v2510_v12 = vpop.eup %2509 }
 0x314   :  { %v1012_v19 = vmul.f32 %v2510_v12, %v1006_v38  ;;  %v3434_v12 = vld [vmem:[#allocation33_spill] sm:$0xff] }
 0x316   :  { %v3237_v43 = vsel %vm1018_vm9, %v1012_v19, %v3187_v41 }
 0x317   :  { %v1026_v11 = vpack.c.bf16 %v3237_v43, %v3237_v43 }
 0x319   :  { %1035 = vmatmul.bf16.vlgmr.msrb.gmra.mxu0 %v1026_v11  ;;  %1048 = vmatmul.bf16.vlgmr.msrb.gmra.mxu1 %v1026_v11 }
 0x31a   :  { %1061 = vmatmul.bf16.vlgmr.msra.gmra.mxu2 %v1026_v11  ;;  %1074 = vmatmul.bf16.vlgmr.msra.gmra.mxu3 %v1026_v11 }
 0x31b   :  { %1293 = vmatpush.bf16.msrb.mxu0 %v2778_v23  ;;  %1306 = vmatpush.bf16.msrb.mxu1 %v2784_v27 }
 0x31c   :  { %1319 = vmatpush.bf16.msra.mxu2 %v2795_v42  ;;  %1332 = vmatpush.bf16.msra.mxu3 %v2776_v22 }
 0x31f   :  { %1294 = vmatpush.bf16.msrb.mxu0 %v2788_v33  ;;  %1307 = vmatpush.bf16.msrb.mxu1 %v2793_v36 }
 0x320   :  { %1320 = vmatpush.bf16.msra.mxu2 %v2807_v54  ;;  %1333 = vmatpush.bf16.msra.mxu3 %v2790_v34 }
 0x323   :  { %1295 = vmatpush.bf16.msrb.mxu0 %v2799_v44  ;;  %1308 = vmatpush.bf16.msrb.mxu1 %v2802_v46 }
 0x324   :  { %1321 = vmatpush.bf16.msra.mxu2 %v2821_v3  ;;  %1334 = vmatpush.bf16.msra.mxu3 %v2805_v49 }
 0x327   :  { %1296 = vmatpush.bf16.msrb.mxu0 %v2810_v56  ;;  %1309 = vmatpush.bf16.msrb.mxu1 %v2819_v2 }
 0x328   :  { %1322 = vmatpush.bf16.msra.mxu2 %v2844_v21  ;;  %1335 = vmatpush.bf16.msra.mxu3 %v2817_v63 }
 0x32b   :  { %1297 = vmatpush.bf16.msrb.mxu0 %v2824_v4  ;;  %1310 = vmatpush.bf16.msrb.mxu1 %v2836_v15 }
 0x32c   :  { %1323 = vmatpush.bf16.msra.mxu2 %v2856_v32  ;;  %1336 = vmatpush.bf16.msra.mxu3 %v2839_v16 }
 0x32f   :  { %1298 = vmatpush.bf16.msrb.mxu0 %v2842_v20  ;;  %1311 = vmatpush.bf16.msrb.mxu1 %v2853_v31 }
 0x330   :  { %1324 = vmatpush.bf16.msra.mxu2 %v2883_v0  ;;  %1337 = vmatpush.bf16.msra.mxu3 %v2848_v30 }
 0x333   :  { %1299 = vmatpush.bf16.msrb.mxu0 %v2859_v35  ;;  %1312 = vmatpush.bf16.msrb.mxu1 %v2863_v45 }
 0x334   :  { %1325 = vmatpush.bf16.msra.mxu2 %v2890_v6  ;;  %1338 = vmatpush.bf16.msra.mxu3 %v2880_v58 }
 0x337   :  { %1300 = vmatpush.bf16.msrb.mxu0 %v2867_v47  ;;  %1313 = vmatpush.bf16.msrb.mxu1 %v2870_v52 }
 0x338   :  { %1326 = vmatpush.bf16.msra.mxu2 %v2896_v10  ;;  %1339 = vmatpush.bf16.msra.mxu3 %v2887_v60 }
 0x396   :  { %v1036_v51 = vpop.f32.mrf.mxu0  ;;  %v1049_v41 = vpop.f32.mrf.mxu1 }
 0x397   :  { %v1079_v61 = vadd.f32 %v1036_v51, %v3431_v57  ;;  %v1080_v50 = vadd.f32 %v1049_v41, %v3432_v48 }
 0x399   :  { %v2142_v28 = vmul.f32 -1.442695, %v1079_v61  ;;  %v2143_v55 = vmul.f32 -1.442695, %v1080_v50 }
 0x39b   :  { %2511 = vpow2.f32 %v2142_v28 }
 0x39c   :  { %2513 = vpow2.f32 %v2143_v55 }
 0x39d   :  { %v1062_v62 = vpop.f32.mrf.mxu2  ;;  %v1075_v13 = vpop.f32.mrf.mxu3 }
 0x39e   :  { %v1082_v25 = vadd.f32 %v1075_v13, %v3433_v5  ;;  %v1038_v26 = vpop.f32.mrf.mxu0  ;;  %v1051_v1 = vpop.f32.mrf.mxu1  ;;  %v1081_v38 = vadd.f32 %v1062_v62, %v3434_v12 }
 0x3a0   :  { %v2144_v17 = vmul.f32 -1.442695, %v1082_v25 }
 0x3a1   :  { %v2512_v40 = vpop.eup %2511 }
 0x3a2   :  { %v2514_v7 = vpop.eup %2513  ;;  %v1086_v39 = vadd.f32 1.0, %v2512_v40  ;;  %2515 = vpow2.f32 %v2144_v17 }
 0x3a3   :  { %v1105_v53 = vadd.f32 1.0, %v2514_v7 }
 0x3a4   :  { %2517 = vrcp.f32 %v1086_v39  ;;  %v1098_v61 = vand.u32 2147483648, %v1086_v39  ;;  %v1096_v50 = vand.u32 2147483647, %v1086_v39  ;;  %vm1092_vm0 = vweird.f32 %v1086_v39 }
 0x3a5   :  { %2519 = vrcp.f32 %v1105_v53  ;;  %v1064_v29 = vpop.f32.mrf.mxu2  ;;  %v1077_v37 = vpop.f32.mrf.mxu3  ;;  %v1117_v28 = vand.u32 2147483648, %v1105_v53  ;;  %v1115_v13 = vand.u32 2147483647, %v1105_v53  ;;  %vm1111_vm2 = vweird.f32 %v1105_v53 }
 0x3a6   :  { %v1099_v62 = vor.u32 1.1754944e-38, %v1098_v61  ;;  %vm1097_vm3 = vcmp.eq.f32.partialorder %v1096_v50, 8.507059e+37 }
 0x3a7   :  { %v1118_v40 = vor.u32 1.1754944e-38, %v1117_v28  ;;  %vm1116_vm5 = vcmp.eq.f32.partialorder %v1115_v13, 8.507059e+37 }
 0x3a8   :  { %v2516_v18 = vpop.eup %2515 }
 0x3a9   :  { %v1125_v9 = vadd.f32 1.0, %v2516_v18  ;;  %v1150_v18 = vpop.permute.xlu2 %1149 }
 0x3aa   :  { %v2518_v14 = vpop.eup %2517  ;;  %vm1151_vm6 = vcmp.eq.s32.totalorder %v1150_v18, 1 }
 0x3ab   :  { %v2520_v19 = vpop.eup %2519  ;;  %v1088_v11 = vmul.f32 %v2518_v14, %v1086_v39  ;;  %2521 = vrcp.f32 %v1125_v9  ;;  %vm1093_vm14 = vweird.f32 %v2518_v14  ;;  %vm1131_vm8 = vweird.f32 %v1125_v9 }
 0x3ac   :  { %v1107_v51 = vmul.f32 %v2520_v19, %v1105_v53  ;;  %2523 = vtanh.f32 %v1081_v38  ;;  %vm1112_vm15 = vweird.f32 %v2520_v19  ;;  %vm1094_vm1 = vmor %vm1092_vm0, %vm1093_vm14  ;;  %v1137_v53 = vand.u32 2147483648, %v1125_v9 }
 0x3ad   :  { %v1089_v41 = vsub.f32 1.0, %v1088_v11  ;;  %vm1113_vm4 = vmor %vm1111_vm2, %vm1112_vm15  ;;  %v1135_v61 = vand.u32 2147483647, %v1125_v9 }
 0x3ae   :  { %v1108_v57 = vsub.f32 1.0, %v1107_v51 }
 0x3af   :  { %v1090_v48 = vmul.f32 %v2518_v14, %v1089_v41  ;;  %vm1136_vm10 = vcmp.eq.f32.partialorder %v1135_v61, 8.507059e+37 }
 0x3b0   :  { %v1109_v55 = vmul.f32 %v2520_v19, %v1108_v57 }
 0x3b1   :  { %v2522_v5 = vpop.eup %2521  ;;  %v1091_v25 = vadd.f32 %v2518_v14, %v1090_v48  ;;  %v1138_v48 = vor.u32 1.1754944e-38, %v1137_v53 }
 0x3b2   :  { %v1127_v26 = vmul.f32 %v2522_v5, %v1125_v9  ;;  %v1110_v1 = vadd.f32 %v2520_v19, %v1109_v55  ;;  %v2524_v7 = vpop.eup %2523  ;;  %vm1132_vm7 = vweird.f32 %v2522_v5 }
 0x3b3   :  { %v1095_v17 = vsel %vm1094_vm1, %v2518_v14, %v1091_v25  ;;  %vm1133_vm9 = vmor %vm1131_vm8, %vm1132_vm7 }
 0x3b4   :  { %v1100_v29 = vsel %vm1097_vm3, %v1099_v62, %v1095_v17  ;;  %v1128_v37 = vsub.f32 1.0, %v1127_v26  ;;  %v1114_v12 = vsel %vm1113_vm4, %v2520_v19, %v1110_v1 }
 0x3b5   :  { %v1142_v38 = vmul.f32 %v2524_v7, %v1100_v29  ;;  %v1119_v11 = vsel %vm1116_vm5, %v1118_v40, %v1114_v12 }
 0x3b6   :  { %v1129_v51 = vmul.f32 %v2522_v5, %v1128_v37  ;;  %v1141_v39 = vmul.f32 %v1119_v11, %v3234_v59 }
 0x3b8   :  { %v1143_v41 = vadd.f32 %v1142_v38, %v1141_v39  ;;  %v1130_v57 = vadd.f32 %v2522_v5, %v1129_v51 }
 0x3ba   :  { %2525 = vtanh.f32 %v1143_v41  ;;  %v3280_v14 = vsel %vm1151_vm6, %v1143_v41, %v3234_v59  ;;  %v1134_v19 = vsel %vm1133_vm9, %v2522_v5, %v1130_v57  ;;  %v1283_v41 = vpop.permute.xlu2 %1282 }
 0x3bb   :  { %v1139_v28 = vsel %vm1136_vm10, %v1138_v48, %v1134_v19  ;;  %vm1284_vm3 = vcmp.eq.s32.totalorder %v1283_v41, 1 }
 0x3c0   :  { %v2526_v50 = vpop.eup %2525 }
 0x3c1   :  { %v1145_v55 = vmul.f32 %v2526_v50, %v1139_v28 }
 0x3c3   :  { %v3284_v13 = vsel %vm1151_vm6, %v1145_v55, %v3237_v43 }
 0x3c4   :  { %v1159_v25 = vpack.c.bf16 %v3284_v13, %v3284_v13 }
 0x3c6   :  { %1168 = vmatmul.bf16.vlgmr.msra.gmra.mxu0 %v1159_v25  ;;  %1181 = vmatmul.bf16.vlgmr.msra.gmra.mxu1 %v1159_v25 }
 0x3c7   :  { %1194 = vmatmul.bf16.vlgmr.msrb.gmra.mxu2 %v1159_v25  ;;  %1207 = vmatmul.bf16.vlgmr.msrb.gmra.mxu3 %v1159_v25 }
 0x3c8   :  { %1426 = vmatpush.bf16.msra.mxu0 %v2778_v23  ;;  %1439 = vmatpush.bf16.msra.mxu1 %v2784_v27  ;;  %v3435_v27 = vld [vmem:[#allocation29_spill] sm:$0xff] }
 0x3c9   :  { %1452 = vmatpush.bf16.msrb.mxu2 %v2795_v42  ;;  %1465 = vmatpush.bf16.msrb.mxu3 %v2776_v22 }
 0x3cc   :  { %1427 = vmatpush.bf16.msra.mxu0 %v2788_v33  ;;  %1440 = vmatpush.bf16.msra.mxu1 %v2793_v36 }
 0x3cd   :  { %1453 = vmatpush.bf16.msrb.mxu2 %v2807_v54  ;;  %1466 = vmatpush.bf16.msrb.mxu3 %v2790_v34  ;;  %v3436_v34 = vld [vmem:[#allocation30_spill] sm:$0xff]  ;;  %v3437_v54 = vld [vmem:[#allocation36_spill] sm:$0xff] }
 0x3d0   :  { %1428 = vmatpush.bf16.msra.mxu0 %v2799_v44  ;;  %1441 = vmatpush.bf16.msra.mxu1 %v2802_v46 }
 0x3d1   :  { %1454 = vmatpush.bf16.msrb.mxu2 %v2821_v3  ;;  %1467 = vmatpush.bf16.msrb.mxu3 %v2805_v49 }
 0x3d4   :  { %1429 = vmatpush.bf16.msra.mxu0 %v2810_v56  ;;  %1442 = vmatpush.bf16.msra.mxu1 %v2819_v2 }
 0x3d5   :  { %1455 = vmatpush.bf16.msrb.mxu2 %v2844_v21  ;;  %1468 = vmatpush.bf16.msrb.mxu3 %v2817_v63 }
 0x3d8   :  { %1430 = vmatpush.bf16.msra.mxu0 %v2824_v4  ;;  %1443 = vmatpush.bf16.msra.mxu1 %v2836_v15 }
 0x3d9   :  { %1456 = vmatpush.bf16.msrb.mxu2 %v2856_v32  ;;  %1469 = vmatpush.bf16.msrb.mxu3 %v2839_v16 }
 0x3dc   :  { %1431 = vmatpush.bf16.msra.mxu0 %v2842_v20  ;;  %1444 = vmatpush.bf16.msra.mxu1 %v2853_v31 }
 0x3dd   :  { %1457 = vmatpush.bf16.msrb.mxu2 %v2883_v0  ;;  %1470 = vmatpush.bf16.msrb.mxu3 %v2848_v30 }
 0x3e0   :  { %1432 = vmatpush.bf16.msra.mxu0 %v2859_v35  ;;  %1445 = vmatpush.bf16.msra.mxu1 %v2863_v45  ;;  %v3438_v45 = vld [vmem:[#allocation35_spill] sm:$0xff] }
 0x3e1   :  { %1458 = vmatpush.bf16.msrb.mxu2 %v2890_v6  ;;  %1471 = vmatpush.bf16.msrb.mxu3 %v2880_v58 }
 0x3e4   :  { %1433 = vmatpush.bf16.msra.mxu0 %v2867_v47  ;;  %1446 = vmatpush.bf16.msra.mxu1 %v2870_v52 }
 0x3e5   :  { %1459 = vmatpush.bf16.msrb.mxu2 %v2896_v10  ;;  %1472 = vmatpush.bf16.msrb.mxu3 %v2887_v60 }
 0x443   :  { %v1169_v22 = vpop.f32.mrf.mxu0  ;;  %v1182_v23 = vpop.f32.mrf.mxu1 }
 0x444   :  { %v1212_v33 = vadd.f32 %v1169_v22, %v3435_v27  ;;  %v1213_v36 = vadd.f32 %v1182_v23, %v3436_v34 }
 0x446   :  { %v2145_v42 = vmul.f32 -1.442695, %v1212_v33  ;;  %v2146_v44 = vmul.f32 -1.442695, %v1213_v36 }
 0x448   :  { %2527 = vpow2.f32 %v2145_v42  ;;  %v3439_v42 = vld [vmem:[#allocation16_spill] sm:$0xff] }
 0x449   :  { %2529 = vpow2.f32 %v2146_v44 }
 0x44a   :  { %v1195_v46 = vpop.f32.mrf.mxu2  ;;  %v1208_v49 = vpop.f32.mrf.mxu3 }
 0x44b   :  { %v1215_v56 = vadd.f32 %v1208_v49, %v3437_v54  ;;  %v1171_v63 = vpop.f32.mrf.mxu0  ;;  %v1184_v2 = vpop.f32.mrf.mxu1  ;;  %v1214_v47 = vadd.f32 %v1195_v46, %v3438_v45  ;;  %v3440_v46 = vld [vmem:[#allocation17_spill] sm:$0xff] }
 0x44c   :  { %v3441_v2 = vld [vmem:[#allocation38_spill] sm:$0xff] }
 0x44d   :  { %v2147_v3 = vmul.f32 -1.442695, %v1215_v56 }
 0x44e   :  { %v2528_v4 = vpop.eup %2527 }
 0x44f   :  { %v2530_v15 = vpop.eup %2529  ;;  %v1219_v16 = vadd.f32 1.0, %v2528_v4  ;;  %2531 = vpow2.f32 %v2147_v3 }
 0x450   :  { %v1238_v20 = vadd.f32 1.0, %v2530_v15 }
 0x451   :  { %2533 = vrcp.f32 %v1219_v16  ;;  %v1231_v10 = vand.u32 2147483648, %v1219_v16  ;;  %v1229_v9 = vand.u32 2147483647, %v1219_v16  ;;  %vm1225_vm13 = vweird.f32 %v1219_v16 }
 0x452   :  { %2535 = vrcp.f32 %v1238_v20  ;;  %v1197_v21 = vpop.f32.mrf.mxu2  ;;  %v1210_v30 = vpop.f32.mrf.mxu3  ;;  %v1250_v59 = vand.u32 2147483648, %v1238_v20  ;;  %v1248_v62 = vand.u32 2147483647, %v1238_v20  ;;  %vm1244_vm14 = vweird.f32 %v1238_v20 }
 0x453   :  { %v1232_v17 = vor.u32 1.1754944e-38, %v1231_v10  ;;  %vm1230_vm1 = vcmp.eq.f32.partialorder %v1229_v9, 8.507059e+37 }
 0x454   :  { %v1251_v29 = vor.u32 1.1754944e-38, %v1250_v59  ;;  %vm1249_vm2 = vcmp.eq.f32.partialorder %v1248_v62, 8.507059e+37 }
 0x455   :  { %v2532_v31 = vpop.eup %2531 }
 0x456   :  { %v1258_v32 = vadd.f32 1.0, %v2532_v31 }
 0x457   :  { %v2534_v35 = vpop.eup %2533 }
 0x458   :  { %v2536_v52 = vpop.eup %2535  ;;  %v1221_v58 = vmul.f32 %v2534_v35, %v1219_v16  ;;  %2537 = vrcp.f32 %v1258_v32  ;;  %vm1226_vm11 = vweird.f32 %v2534_v35  ;;  %v1270_v48 = vand.u32 2147483648, %v1258_v32 }
 0x459   :  { %v1240_v0 = vmul.f32 %v2536_v52, %v1238_v20  ;;  %2539 = vtanh.f32 %v1214_v47  ;;  %vm1245_vm12 = vweird.f32 %v2536_v52  ;;  %vm1227_vm15 = vmor %vm1225_vm13, %vm1226_vm11  ;;  %vm1264_vm5 = vweird.f32 %v1258_v32 }
 0x45a   :  { %v1222_v60 = vsub.f32 1.0, %v1221_v58  ;;  %vm1246_vm0 = vmor %vm1244_vm14, %vm1245_vm12  ;;  %v1268_v28 = vand.u32 2147483647, %v1258_v32  ;;  %v1271_v25 = vor.u32 1.1754944e-38, %v1270_v48  ;;  %v3442_v58 = vld [vmem:[#allocation37_spill] sm:$0xff] }
 0x45b   :  { %v1241_v6 = vsub.f32 1.0, %v1240_v0 }
 0x45c   :  { %v1223_v43 = vmul.f32 %v2534_v35, %v1222_v60  ;;  %vm1269_vm7 = vcmp.eq.f32.partialorder %v1268_v28, 8.507059e+37 }
 0x45d   :  { %v1242_v5 = vmul.f32 %v2536_v52, %v1241_v6 }
 0x45e   :  { %v2538_v26 = vpop.eup %2537  ;;  %v1224_v1 = vadd.f32 %v2534_v35, %v1223_v43 }
 0x45f   :  { %v1243_v40 = vadd.f32 %v2536_v52, %v1242_v5  ;;  %v1260_v7 = vmul.f32 %v2538_v26, %v1258_v32  ;;  %v2540_v18 = vpop.eup %2539  ;;  %vm1265_vm4 = vweird.f32 %v2538_v26 }
 0x460   :  { %v1228_v37 = vsel %vm1227_vm15, %v2534_v35, %v1224_v1  ;;  %vm1266_vm6 = vmor %vm1264_vm5, %vm1265_vm4 }
 0x461   :  { %v1233_v12 = vsel %vm1230_vm1, %v1232_v17, %v1228_v37  ;;  %v1247_v38 = vsel %vm1246_vm0, %v2536_v52, %v1243_v40  ;;  %v1261_v11 = vsub.f32 1.0, %v1260_v7 }
 0x462   :  { %v1252_v51 = vsel %vm1249_vm2, %v1251_v29, %v1247_v38  ;;  %v1275_v39 = vmul.f32 %v2540_v18, %v1233_v12 }
 0x463   :  { %v1274_v57 = vmul.f32 %v1252_v51, %v3280_v14  ;;  %v1262_v53 = vmul.f32 %v2538_v26, %v1261_v11 }
 0x465   :  { %v1276_v61 = vadd.f32 %v1275_v39, %v1274_v57  ;;  %v1263_v19 = vadd.f32 %v2538_v26, %v1262_v53 }
 0x467   :  { %2541 = vtanh.f32 %v1276_v61  ;;  %v3326_v50 = vsel %vm1284_vm3, %v1276_v61, %v3280_v14  ;;  %v1267_v55 = vsel %vm1266_vm6, %v2538_v26, %v1263_v19  ;;  %v1416_v61 = vpop.permute.xlu0 %1415 }
 0x468   :  { %v1272_v23 = vsel %vm1269_vm7, %v1271_v25, %v1267_v55  ;;  %vm1417_vm0 = vcmp.eq.s32.totalorder %v1416_v61, 1  ;;  %v2284_v61 = vld [vmem:[#allocation9 + $0xf8] sm:$0xf] }
 0x46d   :  { %v2542_v22 = vpop.eup %2541 }
 0x46e   :  { %v1278_v27 = vmul.f32 %v2542_v22, %v1272_v23 }
 0x470   :  { %v3329_v33 = vsel %vm1284_vm3, %v1278_v27, %v3284_v13 }
 0x471   :  { %v1292_v34 = vpack.c.bf16 %v3329_v33, %v3329_v33 }
 0x473   :  { %1301 = vmatmul.bf16.vlgmr.msrb.gmra.mxu0 %v1292_v34  ;;  %1314 = vmatmul.bf16.vlgmr.msrb.gmra.mxu1 %v1292_v34 }
 0x474   :  { %1327 = vmatmul.bf16.vlgmr.msra.gmra.mxu2 %v1292_v34  ;;  %1340 = vmatmul.bf16.vlgmr.msra.gmra.mxu3 %v1292_v34 }
 0x4f0   :  { %v1302_v14 = vpop.f32.mrf.mxu0  ;;  %v1315_v36 = vpop.f32.mrf.mxu1 }
 0x4f1   :  { %v1345_v44 = vadd.f32 %v1302_v14, %v3439_v42  ;;  %v1346_v49 = vadd.f32 %v1315_v36, %v3440_v46 }
 0x4f3   :  { %v2148_v54 = vmul.f32 -1.442695, %v1345_v44  ;;  %v2149_v56 = vmul.f32 -1.442695, %v1346_v49  ;;  %v2427_v49 = vld [vmem:[#allocation9 + $0x164] sm:$0xf0] }
 0x4f5   :  { %2543 = vpow2.f32 %v2148_v54  ;;  %v2424_v54 = vld [vmem:[#allocation9 + $0x154] sm:$0xf] }
 0x4f6   :  { %2545 = vpow2.f32 %v2149_v56 }
 0x4f7   :  { %v1328_v63 = vpop.f32.mrf.mxu2  ;;  %v1341_v13 = vpop.f32.mrf.mxu3 }
 0x4f8   :  { %v1348_v3 = vadd.f32 %v1341_v13, %v3441_v2  ;;  %v1304_v4 = vpop.f32.mrf.mxu0  ;;  %v1317_v15 = vpop.f32.mrf.mxu1  ;;  %v1347_v0 = vadd.f32 %v1328_v63, %v3442_v58  ;;  %v2326_v63 = vld [vmem:[#allocation9 + $0x168] sm:$0xf0]  ;;  %v2300_v2 = vld [vmem:[#allocation9 + $0x120] sm:$0xf] }
 0x4f9   :  { %v2329_v13 = vor.u32 %v2424_v54, %v2326_v63  ;;  %v2418_v4 = vld [vmem:[#allocation9 + $0x124] sm:$0xf]  ;;  %v2302_v15 = vld [vmem:[#allocation9 + $0x138] sm:$0xf0] }
 0x4fa   :  { %v2150_v16 = vmul.f32 -1.442695, %v1348_v3  ;;  %v2421_v3 = vld [vmem:[#allocation9 + $0x134] sm:$0xf0]  ;;  %v2262_v63 = vld [vmem:[#allocation9 + $0xe0] sm:$0xf0] }
 0x4fb   :  { %v2544_v20 = vpop.eup %2543  ;;  %1868 = vmatpush.bf16.msrb.mxu1 %v2329_v13 }
 0x4fc   :  { %v2546_v21 = vpop.eup %2545  ;;  %v1352_v30 = vadd.f32 1.0, %v2544_v20  ;;  %2547 = vpow2.f32 %v2150_v16  ;;  %v2305_v16 = vor.u32 %v2418_v4, %v2302_v15  ;;  %v2276_v20 = vld [vmem:[#allocation9 + $0xf0] sm:$0xf]  ;;  %v2382_v4 = vld [vmem:[#allocation9 + $0x4] sm:$0xf] }
 0x4fd   :  { %v1371_v31 = vadd.f32 1.0, %v2546_v21  ;;  %v2415_v21 = vld [vmem:[#allocation9 + $0x104] sm:$0xf0] }
 0x4fe   :  { %2549 = vrcp.f32 %v1352_v30  ;;  %v1364_v9 = vand.u32 2147483648, %v1352_v30  ;;  %v1362_v26 = vand.u32 2147483647, %v1352_v30  ;;  %vm1358_vm10 = vweird.f32 %v1352_v30 }
 0x4ff   :  { %2551 = vrcp.f32 %v1371_v31  ;;  %v1330_v32 = vpop.f32.mrf.mxu2  ;;  %v1343_v35 = vpop.f32.mrf.mxu3  ;;  %v1383_v5 = vand.u32 2147483648, %v1371_v31  ;;  %v1381_v17 = vand.u32 2147483647, %v1371_v31  ;;  %vm1377_vm11 = vweird.f32 %v1371_v31  ;;  %1869 = vmatpush.bf16.msrb.mxu1 %v2305_v16  ;;  %v3444_v16 = vld [vmem:[#allocation19_spill] sm:$0xff] }
 0x500   :  { %v1365_v29 = vor.u32 1.1754944e-38, %v1364_v9  ;;  %vm1363_vm14 = vcmp.eq.f32.partialorder %v1362_v26, 8.507059e+37  ;;  %v2278_v32 = vld [vmem:[#allocation9 + $0x108] sm:$0xf0]  ;;  %v2334_v9 = vld [vmem:[#allocation9 + $0x170] sm:$0xf0] }
 0x501   :  { %v1384_v12 = vor.u32 1.1754944e-38, %v1383_v5  ;;  %vm1382_vm15 = vcmp.eq.f32.partialorder %v1381_v17, 8.507059e+37  ;;  %v2403_v26 = vld [vmem:[#allocation9 + $0xa4] sm:$0xf0] }
 0x502   :  { %v2548_v45 = vpop.eup %2547 }
 0x503   :  { %v1391_v47 = vadd.f32 1.0, %v2548_v45  ;;  %v2252_v45 = vld [vmem:[#allocation9 + $0xc0] sm:$0xf] }
 0x504   :  { %v2550_v52 = vpop.eup %2549 }
 0x505   :  { %v2552_v60 = vpop.eup %2551  ;;  %v1354_v6 = vmul.f32 %v2550_v52, %v1352_v30  ;;  %2553 = vrcp.f32 %v1391_v47  ;;  %vm1359_vm8 = vweird.f32 %v2550_v52  ;;  %v1403_v25 = vand.u32 2147483648, %v1391_v47  ;;  %v2412_v30 = vld [vmem:[#allocation9 + $0xf4] sm:$0xf] }
 0x506   :  { %v1373_v10 = vmul.f32 %v2552_v60, %v1371_v31  ;;  %2555 = vtanh.f32 %v1347_v0  ;;  %vm1378_vm9 = vweird.f32 %v2552_v60  ;;  %vm1360_vm12 = vmor %vm1358_vm10, %vm1359_vm8  ;;  %vm1397_vm2 = vweird.f32 %v1391_v47  ;;  %v2254_v0 = vld [vmem:[#allocation9 + $0xd8] sm:$0xf0] }
 0x507   :  { %v1355_v59 = vsub.f32 1.0, %v1354_v6  ;;  %vm1379_vm13 = vmor %vm1377_vm11, %vm1378_vm9  ;;  %v1401_v23 = vand.u32 2147483647, %v1391_v47  ;;  %v1404_v34 = vor.u32 1.1754944e-38, %v1403_v25  ;;  %v2277_v31 = vor.u32 %v2415_v21, %v2276_v20  ;;  %v2428_v6 = vld [vmem:[#allocation9 + $0x16c] sm:$0xf0] }
 0x508   :  { %v1374_v43 = vsub.f32 1.0, %v1373_v10  ;;  %v2281_v35 = vor.u32 %v2412_v30, %v2278_v32  ;;  %v2286_v25 = vld [vmem:[#allocation9 + $0x110] sm:$0xf0]  ;;  %v206_v20 = vadd.f32 %v3444_v16, %v2985_v24  ;;  %v2158_v30 = vld [vmem:[#allocation9 + $0x18] sm:$0xf0] }
 0x509   :  { %v1356_v62 = vmul.f32 %v2550_v52, %v1355_v59  ;;  %vm1402_vm4 = vcmp.eq.f32.partialorder %v1401_v23, 8.507059e+37  ;;  %v2404_v32 = vld [vmem:[#allocation9 + $0xac] sm:$0xf0] }
 0x50a   :  { %v1375_v1 = vmul.f32 %v2552_v60, %v1374_v43  ;;  %1870 = vmatpush.bf16.msrb.mxu1 %v2281_v35  ;;  %v2425_v43 = vld [vmem:[#allocation9 + $0x15c] sm:$0xf]  ;;  %v2268_v16 = vld [vmem:[#allocation9 + $0xd0] sm:$0xf] }
 0x50b   :  { %v2554_v40 = vpop.eup %2553  ;;  %v1357_v7 = vadd.f32 %v2550_v52, %v1356_v62  ;;  %v2337_v5 = vor.u32 %v2425_v43, %v2334_v9  ;;  %v2228_v62 = vld [vmem:[#allocation9 + $0x90] sm:$0xf]  ;;  %v2426_v43 = vld [vmem:[#allocation9 + $0x164] sm:$0xf]  ;;  %v2342_v9 = vld [vmem:[#allocation9 + $0x178] sm:$0xf0] }
 0x50c   :  { %v1376_v37 = vadd.f32 %v2552_v60, %v1375_v1  ;;  %v1393_v18 = vmul.f32 %v2554_v40, %v1391_v47  ;;  %v2556_v11 = vpop.eup %2555  ;;  %vm1398_vm1 = vweird.f32 %v2554_v40  ;;  %v2409_v47 = vld [vmem:[#allocation9 + $0xd4] sm:$0xf0]  ;;  %v2400_v1 = vld [vmem:[#allocation9 + $0x94] sm:$0xf]  ;;  %v2229_v17 = vor.u32 %v2403_v26, %v2228_v62 }
 0x50d   :  { %v1361_v38 = vsel %vm1360_vm12, %v2550_v52, %v1357_v7  ;;  %vm1399_vm3 = vmor %vm1397_vm2, %vm1398_vm1  ;;  %v2406_v52 = vld [vmem:[#allocation9 + $0xc4] sm:$0xf]  ;;  %v2253_v58 = vor.u32 %v2409_v47, %v2252_v45  ;;  %1894 = vmatpush.bf16.msra.mxu3 %v2337_v5  ;;  %v2308_v7 = vld [vmem:[#allocation9 + $0x128] sm:$0xf]  ;;  %v2161_v47 = vor.u32 %v2382_v4, %v2158_v30  ;;  %v2345_v5 = vor.u32 %v2426_v43, %v2342_v9 }
 0x50e   :  { %v1366_v51 = vsel %vm1363_vm14, %v1365_v29, %v1361_v38  ;;  %v1380_v39 = vsel %vm1379_vm13, %v2552_v60, %v1376_v37  ;;  %v1394_v41 = vsub.f32 1.0, %v1393_v18  ;;  %v2332_v60 = vld [vmem:[#allocation9 + $0x158] sm:$0xf]  ;;  %v2257_v10 = vor.u32 %v2406_v52, %v2254_v0  ;;  %v2422_v29 = vld [vmem:[#allocation9 + $0x13c] sm:$0xf0] }
 0x50f   :  { %v1385_v57 = vsel %vm1382_vm15, %v1384_v12, %v1380_v39  ;;  %v1408_v53 = vmul.f32 %v2556_v11, %v1366_v51  ;;  %v2333_v59 = vor.u32 %v2428_v6, %v2332_v60  ;;  %v2309_v18 = vor.u32 %v2422_v29, %v2308_v7  ;;  %v2419_v12 = vld [vmem:[#allocation9 + $0x12c] sm:$0xf]  ;;  %v2310_v38 = vld [vmem:[#allocation9 + $0x140] sm:$0xf0]  ;;  %v2204_v51 = vld [vmem:[#allocation9 + $0x60] sm:$0xf] }
 0x510   :  { %v1407_v19 = vmul.f32 %v1385_v57, %v3326_v50  ;;  %v1395_v48 = vmul.f32 %v2554_v40, %v1394_v41  ;;  %1871 = vmatpush.bf16.msrb.mxu1 %v2257_v10  ;;  %v2313_v11 = vor.u32 %v2419_v12, %v2310_v38  ;;  %v2397_v39 = vld [vmem:[#allocation9 + $0x74] sm:$0xf0]  ;;  %v2394_v41 = vld [vmem:[#allocation9 + $0x64] sm:$0xf]  ;;  %v2238_v0 = vld [vmem:[#allocation9 + $0xb0] sm:$0xf0] }
 0x511   :  { %1881 = vmatpush.bf16.msra.mxu2 %v2333_v59  ;;  %v2205_v57 = vor.u32 %v2397_v39, %v2204_v51  ;;  %v2340_v60 = vld [vmem:[#allocation9 + $0x160] sm:$0xf]  ;;  %v2214_v7 = vld [vmem:[#allocation9 + $0x80] sm:$0xf0]  ;;  %v2423_v12 = vld [vmem:[#allocation9 + $0x144] sm:$0xf0] }
 0x512   :  { %v1409_v28 = vadd.f32 %v1408_v53, %v1407_v19  ;;  %v1396_v55 = vadd.f32 %v2554_v40, %v1395_v48  ;;  %1895 = vmatpush.bf16.msra.mxu3 %v2313_v11  ;;  %v2206_v53 = vld [vmem:[#allocation9 + $0x78] sm:$0xf0]  ;;  %v2416_v19 = vld [vmem:[#allocation9 + $0x10c] sm:$0xf0]  ;;  %v2420_v38 = vld [vmem:[#allocation9 + $0x134] sm:$0xf] }
 0x513   :  { %v2209_v48 = vor.u32 %v2394_v41, %v2206_v53  ;;  %v2318_v51 = vld [vmem:[#allocation9 + $0x148] sm:$0xf0]  ;;  %v2188_v53 = vld [vmem:[#allocation9 + $0x38] sm:$0xf]  ;;  %v2411_v30 = vld [vmem:[#allocation9 + $0xe4] sm:$0xf0] }
 0x514   :  { %2557 = vtanh.f32 %v1409_v28  ;;  %v3339_v22 = vsel %vm1417_vm0, %v1409_v28, %v3326_v50  ;;  %v1400_v27 = vsel %vm1399_vm3, %v2554_v40, %v1396_v55  ;;  %v2324_v50 = vld [vmem:[#allocation9 + $0x150] sm:$0xf]  ;;  %v2230_v40 = vld [vmem:[#allocation9 + $0xa8] sm:$0xf0]  ;;  %v2285_v28 = vor.u32 %v2416_v19, %v2284_v61  ;;  %v2413_v55 = vld [vmem:[#allocation9 + $0xfc] sm:$0xf] }
 0x515   :  { %v1405_v36 = vsel %vm1402_vm4, %v1404_v34, %v1400_v27  ;;  %v2325_v56 = vor.u32 %v2427_v49, %v2324_v50  ;;  %v2233_v37 = vor.u32 %v2400_v1, %v2230_v40  ;;  %1882 = vmatpush.bf16.msra.mxu2 %v2309_v18  ;;  %v2289_v23 = vor.u32 %v2413_v55, %v2286_v25  ;;  %v2180_v27 = vld [vmem:[#allocation9 + $0x30] sm:$0xf]  ;;  %v2391_v34 = vld [vmem:[#allocation9 + $0x44] sm:$0xf0]  ;;  %v2410_v50 = vld [vmem:[#allocation9 + $0xdc] sm:$0xf0] }
 0x516   :  { %v2212_v1 = vld [vmem:[#allocation9 + $0x68] sm:$0xf]  ;;  %v2395_v40 = vld [vmem:[#allocation9 + $0x6c] sm:$0xf]  ;;  %v2316_v18 = vld [vmem:[#allocation9 + $0x130] sm:$0xf] }
 0x517   :  { %1855 = vmatpush.bf16.msrb.mxu0 %v2325_v56  ;;  %1872 = vmatpush.bf16.msrb.mxu1 %v2233_v37  ;;  %v2407_v56 = vld [vmem:[#allocation9 + $0xcc] sm:$0xf]  ;;  %v2217_v37 = vor.u32 %v2395_v40, %v2214_v7  ;;  %v2317_v11 = vor.u32 %v2423_v12, %v2316_v18  ;;  %v2392_v61 = vld [vmem:[#allocation9 + $0x4c] sm:$0xf0]  ;;  %v2389_v19 = vld [vmem:[#allocation9 + $0x3c] sm:$0xf] }
 0x518   :  { %1896 = vmatpush.bf16.msra.mxu3 %v2289_v23  ;;  %v2265_v13 = vor.u32 %v2407_v56, %v2262_v63  ;;  %v2189_v23 = vor.u32 %v2392_v61, %v2188_v53  ;;  %v2164_v63 = vld [vmem:[#allocation9 + $0x8] sm:$0xf]  ;;  %v2220_v43 = vld [vmem:[#allocation9 + $0x70] sm:$0xf]  ;;  %v2196_v12 = vld [vmem:[#allocation9 + $0x40] sm:$0xf] }
 0x519   :  { %1883 = vmatpush.bf16.msra.mxu2 %v2285_v28  ;;  %v2399_v9 = vld [vmem:[#allocation9 + $0x84] sm:$0xf0] }
 0x51a   :  { %v2558_v14 = vpop.eup %2557 }
 0x51b   :  { %v1411_v42 = vmul.f32 %v2558_v14, %v1405_v36  ;;  %1873 = vmatpush.bf16.msrb.mxu1 %v2209_v48  ;;  %v2388_v14 = vld [vmem:[#allocation9 + $0x34] sm:$0xf]  ;;  %v2181_v36 = vor.u32 %v2391_v34, %v2180_v27  ;;  %v2292_v34 = vld [vmem:[#allocation9 + $0x100] sm:$0xf] }
 0x51c   :  { %1897 = vmatpush.bf16.msra.mxu3 %v2265_v13  ;;  %v3445_v48 = vld [vmem:[#allocation40_spill] sm:$0xff]  ;;  %v2386_v13 = vld [vmem:[#allocation9 + $0x1c] sm:$0xf0] }
 0x51d   :  { %v3342_v44 = vsel %vm1417_vm0, %v1411_v42, %v3329_v33  ;;  %v2301_v33 = vor.u32 %v2421_v3, %v2300_v2  ;;  %v2182_v42 = vld [vmem:[#allocation9 + $0x48] sm:$0xf0]  ;;  %v2156_v2 = vld [vmem:[#allocation9] sm:$0xf]  ;;  %v2385_v3 = vld [vmem:[#allocation9 + $0x14] sm:$0xf0] }
 0x51e   :  { %v1425_v46 = vpack.c.bf16 %v3342_v44, %v3342_v44  ;;  %v2185_v49 = vor.u32 %v2388_v14, %v2182_v42  ;;  %v2157_v21 = vor.u32 %v2385_v3, %v2156_v2  ;;  %v2190_v27 = vld [vmem:[#allocation9 + $0x50] sm:$0xf0]  ;;  %v2417_v14 = vld [vmem:[#allocation9 + $0x114] sm:$0xf0]  ;;  %v2383_v2 = vld [vmem:[#allocation9 + $0xc] sm:$0xf] }
 0x51f   :  { %1856 = vmatpush.bf16.msrb.mxu0 %v2301_v33  ;;  %v3443_v33 = vld [vmem:[#allocation18_spill] sm:$0xff]  ;;  %v2293_v42 = vor.u32 %v2417_v14, %v2292_v34 }
 0x520   :  { %1434 = vmatmul.bf16.vlgmr.msra.gmra.mxu0 %v1425_v46  ;;  %1447 = vmatmul.bf16.vlgmr.msra.gmra.mxu1 %v1425_v46  ;;  %v177_v15 = vadd.f32 %v3443_v33, %v2983_v8  ;;  %v2429_v8 = vld [vmem:[#allocation9 + $0x174] sm:$0xf0]  ;;  %v2165_v33 = vor.u32 %v2386_v13, %v2164_v63 }
 0x521   :  { %1460 = vmatmul.bf16.vlgmr.msrb.gmra.mxu2 %v1425_v46  ;;  %1473 = vmatmul.bf16.vlgmr.msrb.gmra.mxu3 %v1425_v46  ;;  %v2260_v46 = vld [vmem:[#allocation9 + $0xc8] sm:$0xf]  ;;  %v2341_v24 = vor.u32 %v2429_v8, %v2340_v60  ;;  %v2402_v60 = vld [vmem:[#allocation9 + $0xa4] sm:$0xf] }
 0x522   :  { %v2261_v54 = vor.u32 %v2410_v50, %v2260_v46  ;;  %1874 = vmatpush.bf16.msrb.mxu1 %v2185_v49  ;;  %v2414_v46 = vld [vmem:[#allocation9 + $0x104] sm:$0xf]  ;;  %v2294_v50 = vld [vmem:[#allocation9 + $0x118] sm:$0xf0] }
 0x523   :  { %1857 = vmatpush.bf16.msrb.mxu0 %v2277_v31  ;;  %v2236_v31 = vld [vmem:[#allocation9 + $0x98] sm:$0xf] }
 0x524   :  { %1884 = vmatpush.bf16.msra.mxu2 %v2261_v54  ;;  %v2237_v52 = vor.u32 %v2404_v32, %v2236_v31  ;;  %v2297_v54 = vor.u32 %v2414_v46, %v2294_v50  ;;  %v2408_v31 = vld [vmem:[#allocation9 + $0xd4] sm:$0xf]  ;;  %v2270_v32 = vld [vmem:[#allocation9 + $0xe8] sm:$0xf0] }
 0x526   :  { %1875 = vmatpush.bf16.msrb.mxu1 %v2161_v47  ;;  %v2244_v47 = vld [vmem:[#allocation9 + $0xa0] sm:$0xf] }
 0x527   :  { %1858 = vmatpush.bf16.msrb.mxu0 %v2253_v58  ;;  %v2401_v58 = vld [vmem:[#allocation9 + $0x9c] sm:$0xf] }
 0x528   :  { %v2241_v59 = vor.u32 %v2401_v58, %v2238_v0  ;;  %1885 = vmatpush.bf16.msra.mxu2 %v2237_v52  ;;  %v2269_v52 = vor.u32 %v2411_v30, %v2268_v16  ;;  %v2273_v58 = vor.u32 %v2408_v31, %v2270_v32  ;;  %v2405_v0 = vld [vmem:[#allocation9 + $0xb4] sm:$0xf0] }
 0x52a   :  { %1898 = vmatpush.bf16.msra.mxu3 %v2241_v59  ;;  %1920 = vmatpush.bf16.msra.mxu1 %v2345_v5  ;;  %v2245_v59 = vor.u32 %v2405_v0, %v2244_v47  ;;  %v2396_v5 = vld [vmem:[#allocation9 + $0x74] sm:$0xf] }
 0x52b   :  { %1859 = vmatpush.bf16.msrb.mxu0 %v2229_v17  ;;  %v2398_v17 = vld [vmem:[#allocation9 + $0x7c] sm:$0xf0] }
 0x52c   :  { %v2213_v29 = vor.u32 %v2398_v17, %v2212_v1  ;;  %v3446_v1 = vld [vmem:[#allocation39_spill] sm:$0xff] }
 0x52e   :  { %1886 = vmatpush.bf16.msra.mxu2 %v2213_v29  ;;  %1899 = vmatpush.bf16.msra.mxu3 %v2217_v37  ;;  %v2221_v37 = vor.u32 %v2399_v9, %v2220_v43 }
 0x52f   :  { %1860 = vmatpush.bf16.msrb.mxu0 %v2205_v57  ;;  %v2321_v57 = vor.u32 %v2420_v38, %v2318_v51  ;;  %v2393_v38 = vld [vmem:[#allocation9 + $0x54] sm:$0xf0]  ;;  %v2390_v51 = vld [vmem:[#allocation9 + $0x44] sm:$0xf] }
 0x531   :  { %1921 = vmatpush.bf16.msra.mxu1 %v2321_v57 }
 0x532   :  { %1887 = vmatpush.bf16.msra.mxu2 %v2189_v23  ;;  %v2172_v23 = vld [vmem:[#allocation9 + $0x10] sm:$0xf] }
 0x533   :  { %1861 = vmatpush.bf16.msrb.mxu0 %v2181_v36  ;;  %v2193_v36 = vor.u32 %v2389_v19, %v2190_v27  ;;  %v2387_v27 = vld [vmem:[#allocation9 + $0x24] sm:$0xf0] }
 0x534   :  { %v2173_v63 = vor.u32 %v2387_v27, %v2172_v23 }
 0x535   :  { %1900 = vmatpush.bf16.msra.mxu3 %v2193_v36  ;;  %1922 = vmatpush.bf16.msra.mxu1 %v2297_v54  ;;  %v2384_v36 = vld [vmem:[#allocation9 + $0x14] sm:$0xf] }
 0x536   :  { %1888 = vmatpush.bf16.msra.mxu2 %v2165_v33 }
 0x537   :  { %1862 = vmatpush.bf16.msrb.mxu0 %v2157_v21 }
 0x539   :  { %1923 = vmatpush.bf16.msra.mxu1 %v2273_v58 }
 0x53b   :  { %1907 = vmatpush.bf16.msra.mxu0 %v2341_v24 }
 0x53f   :  { %1908 = vmatpush.bf16.msra.mxu0 %v2317_v11 }
 0x543   :  { %1909 = vmatpush.bf16.msra.mxu0 %v2293_v42  ;;  %v2174_v42 = vld [vmem:[#allocation9 + $0x28] sm:$0xf0] }
 0x547   :  { %1910 = vmatpush.bf16.msra.mxu0 %v2269_v52  ;;  %v1549_v52 = vpop.permute.xlu1 %1548 }
 0x548   :  { %vm1550_vm1 = vcmp.eq.s32.totalorder %v1549_v52, 1 }
 0x54b   :  { %1911 = vmatpush.bf16.msra.mxu0 %v2245_v59 }
 0x54f   :  { %1912 = vmatpush.bf16.msra.mxu0 %v2221_v37 }
 0x59d   :  { %v1435_v35 = vpop.f32.mrf.mxu0  ;;  %v1448_v45 = vpop.f32.mrf.mxu1 }
 0x59e   :  { %v1478_v6 = vadd.f32 %v1435_v35, %v177_v15  ;;  %v1479_v10 = vadd.f32 %v1448_v45, %v206_v20  ;;  %v2166_v15 = vld [vmem:[#allocation9 + $0x20] sm:$0xf0] }
 0x59f   :  { %v2169_v21 = vor.u32 %v2383_v2, %v2166_v15 }
 0x5a0   :  { %v2151_v62 = vmul.f32 -1.442695, %v1478_v6  ;;  %v2152_v26 = vmul.f32 -1.442695, %v1479_v10  ;;  %v2246_v6 = vld [vmem:[#allocation9 + $0xb8] sm:$0xf0] }
 0x5a1   :  { %1901 = vmatpush.bf16.msra.mxu3 %v2169_v21  ;;  %v2249_v8 = vor.u32 %v2402_v60, %v2246_v6 }
 0x5a2   :  { %2559 = vpow2.f32 %v2151_v62  ;;  %v2222_v62 = vld [vmem:[#allocation9 + $0x88] sm:$0xf0] }
 0x5a3   :  { %2561 = vpow2.f32 %v2152_v26  ;;  %1924 = vmatpush.bf16.msra.mxu1 %v2249_v8  ;;  %v2225_v18 = vor.u32 %v2396_v5, %v2222_v62 }
 0x5a4   :  { %v3350_v39 = vpop.f32.mrf.mxu2  ;;  %v1474_v41 = vpop.f32.mrf.mxu3 }
 0x5a5   :  { %v1481_v28 = vadd.f32 %v1474_v41, %v3445_v48  ;;  %v1437_v55 = vpop.f32.mrf.mxu0  ;;  %v1450_v25 = vpop.f32.mrf.mxu1  ;;  %v1480_v17 = vadd.f32 %v3350_v39, %v3446_v1  ;;  %v2198_v41 = vld [vmem:[#allocation9 + $0x58] sm:$0xf0] }
 0x5a6   :  { %v2197_v55 = vor.u32 %v2393_v38, %v2196_v12  ;;  %v2201_v25 = vor.u32 %v2390_v51, %v2198_v41 }
 0x5a7   :  { %v2153_v49 = vmul.f32 -1.442695, %v1481_v28  ;;  %1925 = vmatpush.bf16.msra.mxu1 %v2225_v18 }
 0x5a8   :  { %v2560_v56 = vpop.eup %2559  ;;  %1913 = vmatpush.bf16.msra.mxu0 %v2197_v55 }
 0x5a9   :  { %v2562_v3 = vpop.eup %2561  ;;  %v3353_v4 = vadd.f32 1.0, %v2560_v56  ;;  %2563 = vpow2.f32 %v2153_v49 }
 0x5aa   :  { %v3355_v20 = vadd.f32 1.0, %v2562_v3 }
 0x5ab   :  { %2565 = vrcp.f32 %v3353_v4  ;;  %v1495_v53 = vand.u32 2147483647, %v3353_v4  ;;  %v1497_v39 = vand.u32 2147483648, %v3353_v4  ;;  %vm1491_vm8 = vweird.f32 %v3353_v4  ;;  %1926 = vmatpush.bf16.msra.mxu1 %v2201_v25 }
 0x5ac   :  { %2567 = vrcp.f32 %v3355_v20  ;;  %v1463_v35 = vpop.f32.mrf.mxu2  ;;  %v1476_v45 = vpop.f32.mrf.mxu3  ;;  %v1516_v61 = vand.u32 2147483648, %v3355_v20  ;;  %v1514_v48 = vand.u32 2147483647, %v3355_v20  ;;  %vm1510_vm7 = vweird.f32 %v3355_v20  ;;  %1914 = vmatpush.bf16.msra.mxu0 %v2173_v63 }
 0x5ad   :  { %vm1496_vm10 = vcmp.eq.f32.partialorder %v1495_v53, 8.507059e+37  ;;  %v1498_v46 = vor.u32 1.1754944e-38, %v1497_v39 }
 0x5ae   :  { %v1517_v54 = vor.u32 1.1754944e-38, %v1516_v61  ;;  %vm1515_vm12 = vcmp.eq.f32.partialorder %v1514_v48, 8.507059e+37 }
 0x5af   :  { %v2564_v10 = vpop.eup %2563 }
 0x5b0   :  { %v3359_v24 = vadd.f32 1.0, %v2564_v10  ;;  %v1601_v10 = vld [vmem:[%s3392_s6] sm:$0x3f]  ;;  %s2715_s6 = smov [#allocation11]  }
 0x5b1   :  { %v2566_v26 = vpop.eup %2565  ;;  %v1603_v59 = vperm.slane %v1601_v10, 0  ;;  %v1604_v8 = vperm.slane %v1601_v10, 1  ;;  %v1606_v62 = vperm.slane %v1601_v10, 3  ;;  %v1607_v37 = vperm.slane %v1601_v10, 4  ;;  %s1944_s29 = sshll.u32 %s2715_s6, 4  ;;  %s1945_s29 = int_to_ptr.vmem [resolvable:$true] %s1944_s29 }
 0x5b2   :  { %v2568_v40 = vpop.eup %2567  ;;  %v1487_v7 = vmul.f32 %v2566_v26, %v3353_v4  ;;  %2569 = vrcp.f32 %v3359_v24  ;;  %vm1492_vm5 = vweird.f32 %v2566_v26  ;;  %v2177_v4 = vor.u32 %v2384_v36, %v2174_v42 }
 0x5b3   :  { %v1506_v29 = vmul.f32 %v2568_v40, %v3355_v20  ;;  %2571 = vtanh.f32 %v1480_v17  ;;  %vm1511_vm6 = vweird.f32 %v2568_v40  ;;  %vm1493_vm9 = vmor %vm1491_vm8, %vm1492_vm5  ;;  %v1536_v32 = vand.u32 2147483648, %v3359_v24 }
 0x5b4   :  { %v1488_v11 = vsub.f32 1.0, %v1487_v7  ;;  %vm1512_vm11 = vmor %vm1510_vm7, %vm1511_vm6  ;;  %1927 = vmatpush.bf16.msra.mxu1 %v2177_v4  ;;  %vm1530_vm14 = vweird.f32 %v3359_v24  ;;  %v1534_v35 = vand.u32 2147483647, %v3359_v24  ;;  %v1608_v18 = vperm.slane %v1601_v10, 5 }
 0x5b5   :  { %v1507_v57 = vsub.f32 1.0, %v1506_v29  ;;  %v1537_v47 = vor.u32 1.1754944e-38, %v1536_v32 }
 0x5b6   :  { %v1489_v19 = vmul.f32 %v2566_v26, %v1488_v11  ;;  %vm1535_vm0 = vcmp.eq.f32.partialorder %v1534_v35, 8.507059e+37 }
 0x5b7   :  { %v1508_v28 = vmul.f32 %v2568_v40, %v1507_v57 }
 0x5b8   :  { %v2570_v34 = vpop.eup %2569  ;;  %v1490_v14 = vadd.f32 %v2566_v26, %v1489_v19 }
 0x5b9   :  { %v1509_v50 = vadd.f32 %v2568_v40, %v1508_v28  ;;  %v1526_v49 = vmul.f32 %v2570_v34, %v3359_v24  ;;  %v2572_v13 = vpop.eup %2571  ;;  %vm1531_vm13 = vweird.f32 %v2570_v34 }
 0x5ba   :  { %v1494_v56 = vsel %vm1493_vm9, %v2566_v26, %v1490_v14  ;;  %vm1532_vm15 = vmor %vm1530_vm14, %vm1531_vm13 }
 0x5bb   :  { %v1499_v2 = vsel %vm1496_vm10, %v1498_v46, %v1494_v56  ;;  %v1513_v3 = vsel %vm1512_vm11, %v2568_v40, %v1509_v50  ;;  %v1527_v33 = vsub.f32 1.0, %v1526_v49 }
 0x5bc   :  { %v1518_v15 = vsel %vm1515_vm12, %v1517_v54, %v1513_v3  ;;  %v1541_v16 = vmul.f32 %v2572_v13, %v1499_v2 }
 0x5bd   :  { %v1540_v20 = vmul.f32 %v1518_v15, %v3339_v22  ;;  %v1528_v21 = vmul.f32 %v2570_v34, %v1527_v33 }
 0x5bf   :  { %v1542_v30 = vadd.f32 %v1541_v16, %v1540_v20  ;;  %v1529_v31 = vadd.f32 %v2570_v34, %v1528_v21 }
 0x5c1   :  { %2573 = vtanh.f32 %v1542_v30  ;;  %v1533_v45 = vsel %vm1532_vm15, %v2570_v34, %v1529_v31 }
 0x5c2   :  { %v1538_v22 = vsel %vm1535_vm0, %v1537_v47, %v1533_v45 }
 0x5c7   :  { %v2574_v58 = vpop.eup %2573 }
 0x5c8   :  { %v1544_v0 = vmul.f32 %v2574_v58, %v1538_v22 }
 0x5ca   :  { %v1551_v60 = vsel %vm1550_vm1, %v1544_v0, %v3342_v44  ;;  %v1605_v44 = vperm.slane %v1601_v10, 2 }
 0x5cb   :  { %v1552_v6 = vpack.c.bf16 %v1551_v60, %v1551_v60 }
 0x5cd   :  { %1863 = vmatmul.bf16.vlgmr.msrb.gmra.mxu0 %v1552_v6  ;;  %1876 = vmatmul.bf16.vlgmr.msrb.gmra.mxu1 %v1552_v6 }
 0x5ce   :  { %1889 = vmatmul.bf16.vlgmr.msra.gmra.mxu2 %v1552_v6  ;;  %1902 = vmatmul.bf16.vlgmr.msra.gmra.mxu3 %v1552_v6 }
 0x5dd   :  { %1915 = vmatmul.bf16.vlgmr.msra.gmra.mxu0 %v1552_v6  ;;  %1928 = vmatmul.bf16.vlgmr.msra.gmra.mxu1 %v1552_v6 }
 0x64a   :  { %v1864_v43 = vpop.f32.mrf.mxu0  ;;  %v1877_v9 = vpop.f32.mrf.mxu1 }
 0x64b   :  { %v1865_v24 = vadd.f32 %v1864_v43, %v1603_v59  ;;  %v1878_v5 = vadd.f32 %v1877_v9, %v1604_v8 }
 0x64d   :  { %1933 = vst [vmem:[#allocation11] sm:$0xff] %v1865_v24 }
 0x64e   :  { %1934 = vst [vmem:[#allocation11 + $0x8] sm:$0xff] %v1878_v5 }
 0x651   :  { %v1890_v26 = vpop.f32.mrf.mxu2  ;;  %v1903_v1 = vpop.f32.mrf.mxu3 }
 0x652   :  { %v1891_v17 = vadd.f32 %v1890_v26, %v1605_v44  ;;  %v1904_v40 = vadd.f32 %v1903_v1, %v1606_v62  ;;  %v1866_v7 = vpop.f32.mrf.mxu0  ;;  %v1879_v29 = vpop.f32.mrf.mxu1 }
 0x654   :  { %1935 = vst [vmem:[#allocation11 + $0x10] sm:$0xff] %v1891_v17 }
 0x655   :  { %1936 = vst [vmem:[#allocation11 + $0x18] sm:$0xff] %v1904_v40 }
 0x659   :  { %v1892_v12 = vpop.f32.mrf.mxu2  ;;  %v1905_v38 = vpop.f32.mrf.mxu3 }
 0x65a   :  { %v1916_v11 = vpop.f32.mrf.mxu0  ;;  %v1929_v51 = vpop.f32.mrf.mxu1 }
 0x65b   :  { %v1917_v41 = vadd.f32 %v1916_v11, %v1607_v37  ;;  %v1930_v57 = vadd.f32 %v1929_v51, %v1608_v18 }
 0x65d   :  { %1937 = vst [vmem:[#allocation11 + $0x20] sm:$0xff] %v1917_v41 }
 0x65e   :  { %1938 = vst [vmem:[#allocation11 + $0x28] sm:$0xff] %v1930_v57 }
 0x65f   :  { %1949 = dma.vmem_to_hbm [thread:$0]  %s1945_s29, 768, %s1947_s9, [#allocation5]  }
 0x662   :  { %v1918_v53 = vpop.f32.mrf.mxu0  ;;  %v1931_v39 = vpop.f32.mrf.mxu1 }
 0x663   :  { %2702 = dma.done.wait [#allocation5], 768  }
 0x664   :  { %2703 = vsyncadd [#allocation5], 4294966528 }
 0x665   :  { %1954 = vsyncpa [#allocation4], 1 }
 0x666   :  { %1955 = vsyncpa [#allocation7], 1 }
 0x667   :  { %1956 = vsyncpa [#allocation10], 1 }
 0x668   :  { %1957 = vsyncpa [#allocation5], 1 }

</bundles_post_ra>
